<compile_context>
chip_gen: v7x
topology: tpu7x:2x2x1
jax: 0.10.0
libtpu: 0.0.40
codegen_flags: <defaults>
</compile_context>

<pallas_src>
import functools
import math

import numpy as np
import jax
import jax.numpy as jnp
from jax.experimental import pallas as pl
from jax.experimental.pallas import tpu as pltpu


# Tile targets (review): big tiles cut weight/activation re-streaming on the
# dominant linears; double-buffered bf16 blocks + f32 accumulator stay well
# under every chip's scoped VMEM once vmem_limit_bytes is raised.
TILE_M = 512
TILE_N = 512
TILE_K = 768
VMEM_LIMIT = 48 * 1024 * 1024   # < v7x 64 MiB physical; plenty on v5e/v6e.


def _round_up(x, m):
    return ((x + m - 1) // m) * m


def _fit_div(dim, target):
    """Largest multiple-of-128 divisor of `dim` that is <= target, else dim."""
    if dim <= target:
        return dim
    t = (target // 128) * 128
    while t >= 128:
        if dim % t == 0:
            return t
        t -= 128
    return dim


def _tile_m(M):
    """Row tile: TILE_M for large M, else M rounded up to a sublane multiple."""
    return TILE_M if M >= TILE_M else _round_up(M, 8)


def _pad_rows(x, mult):
    M = x.shape[0]
    Mp = _round_up(M, mult)
    if Mp == M:
        return x
    return jnp.pad(x, ((0, Mp - M), (0, 0)))


# ----------------------------------------------------------------------------
# Tiled linear (bias + optional gelu epilogue)
# ----------------------------------------------------------------------------
def _linear_kernel(x_ref, w_ref, b_ref, o_ref, acc_ref, *, act, k_steps):
    @pl.when(pl.program_id(2) == 0)
    def _init():
        acc_ref[...] = jnp.zeros_like(acc_ref)

    acc_ref[...] += jnp.dot(x_ref[...], w_ref[...],
                            preferred_element_type=jnp.float32)

    @pl.when(pl.program_id(2) == k_steps - 1)
    def _finalize():
        y = acc_ref[...] + b_ref[...]
        if act == "gelu":
            # TODO(synk): PyTorch/HF BERT uses the exact erf GELU; tanh
            # approximation used here (EUP-friendly), logits differ slightly.
            y = jax.nn.gelu(y, approximate=True)
        o_ref[...] = y.astype(o_ref.dtype)


def pallas_linear(x, w, b, act=None, out_dtype=jnp.bfloat16):
    """y = act(x @ w + b), bf16 MXU operands, f32 accumulation."""
    M, K = x.shape
    N = w.shape[1]
    tm = _tile_m(M)
    xp = _pad_rows(x, tm)
    Mp = xp.shape[0]
    tn = _fit_div(N, TILE_N)
    tk = _fit_div(K, TILE_K)
    grid = (Mp // tm, N // tn, K // tk)
    out = pl.pallas_call(
        functools.partial(_linear_kernel, act=act, k_steps=grid[2]),
        out_shape=jax.ShapeDtypeStruct((Mp, N), out_dtype),
        grid=grid,
        in_specs=[
            pl.BlockSpec((tm, tk), lambda i, j, k: (i, k)),
            pl.BlockSpec((tk, tn), lambda i, j, k: (k, j)),
            pl.BlockSpec((1, tn), lambda i, j, k: (0, j)),
        ],
        out_specs=pl.BlockSpec((tm, tn), lambda i, j, k: (i, j)),
        scratch_shapes=[pltpu.VMEM((tm, tn), jnp.float32)],
        compiler_params=pltpu.CompilerParams(
            dimension_semantics=("parallel", "parallel", "arbitrary"),
            vmem_limit_bytes=VMEM_LIMIT),
    )(xp, w, b.reshape(1, N))
    return out[:M] if Mp != M else out


# ----------------------------------------------------------------------------
# Tiled linear with bias + residual add + LayerNorm fused into the epilogue
# (N = hidden kept whole in one tile because LN needs full rows).
# ----------------------------------------------------------------------------
def _linear_res_ln_kernel(x_ref, w_ref, b_ref, res_ref, g_ref, beta_ref,
                          o_ref, acc_ref, *, k_steps, eps):
    @pl.when(pl.program_id(1) == 0)
    def _init():
        acc_ref[...] = jnp.zeros_like(acc_ref)

    acc_ref[...] += jnp.dot(x_ref[...], w_ref[...],
                            preferred_element_type=jnp.float32)

    @pl.when(pl.program_id(1) == k_steps - 1)
    def _finalize():
        y = acc_ref[...] + b_ref[...] + res_ref[...].astype(jnp.float32)
        mu = jnp.mean(y, axis=-1, keepdims=True)
        var = jnp.mean(jnp.square(y - mu), axis=-1, keepdims=True)
        out = (y - mu) * jax.lax.rsqrt(var + eps) * g_ref[...] + beta_ref[...]
        o_ref[...] = out.astype(o_ref.dtype)


def pallas_linear_res_ln(x, w, b, residual, gamma, beta,
                         eps=1e-12, out_dtype=jnp.bfloat16):
    M, K = x.shape
    N = w.shape[1]
    tm = _tile_m(M)
    xp = _pad_rows(x, tm)
    rp = _pad_rows(residual, tm)
    Mp = xp.shape[0]
    tk = _fit_div(K, TILE_K)
    grid = (Mp // tm, K // tk)
    out = pl.pallas_call(
        functools.partial(_linear_res_ln_kernel, k_steps=grid[1], eps=eps),
        out_shape=jax.ShapeDtypeStruct((Mp, N), out_dtype),
        grid=grid,
        in_specs=[
            pl.BlockSpec((tm, tk), lambda i, k: (i, k)),
            pl.BlockSpec((tk, N), lambda i, k: (k, 0)),
            pl.BlockSpec((1, N), lambda i, k: (0, 0)),
            pl.BlockSpec((tm, N), lambda i, k: (i, 0)),
            pl.BlockSpec((1, N), lambda i, k: (0, 0)),
            pl.BlockSpec((1, N), lambda i, k: (0, 0)),
        ],
        out_specs=pl.BlockSpec((tm, N), lambda i, k: (i, 0)),
        scratch_shapes=[pltpu.VMEM((tm, N), jnp.float32)],
        compiler_params=pltpu.CompilerParams(
            dimension_semantics=("parallel", "arbitrary"),
            vmem_limit_bytes=VMEM_LIMIT),
    )(xp, w, b.reshape(1, N), rp, gamma.reshape(1, N), beta.reshape(1, N))
    return out[:M] if Mp != M else out


# ----------------------------------------------------------------------------
# Standalone LayerNorm (embeddings), tiled over rows
# ----------------------------------------------------------------------------
def _layernorm_kernel(x_ref, g_ref, b_ref, o_ref, *, eps):
    x = x_ref[...].astype(jnp.float32)
    mu = jnp.mean(x, axis=-1, keepdims=True)
    var = jnp.mean(jnp.square(x - mu), axis=-1, keepdims=True)
    o_ref[...] = ((x - mu) * jax.lax.rsqrt(var + eps) * g_ref[...]
                  + b_ref[...]).astype(o_ref.dtype)


def pallas_layernorm(x, gamma, beta, eps=1e-12, out_dtype=jnp.bfloat16):
    M, H = x.shape
    tm = _tile_m(M)
    xp = _pad_rows(x, tm)
    Mp = xp.shape[0]
    out = pl.pallas_call(
        functools.partial(_layernorm_kernel, eps=eps),
        out_shape=jax.ShapeDtypeStruct((Mp, H), out_dtype),
        grid=(Mp // tm,),
        in_specs=[
            pl.BlockSpec((tm, H), lambda i: (i, 0)),
            pl.BlockSpec((1, H), lambda i: (0, 0)),
            pl.BlockSpec((1, H), lambda i: (0, 0)),
        ],
        out_specs=pl.BlockSpec((tm, H), lambda i: (i, 0)),
        compiler_params=pltpu.CompilerParams(
            dimension_semantics=("parallel",),
            vmem_limit_bytes=VMEM_LIMIT),
    )(xp, gamma.reshape(1, H), beta.reshape(1, H))
    return out[:M] if Mp != M else out


# ----------------------------------------------------------------------------
# Attention: grid = (batch, head_pair). Each step handles a 128-lane head
# pair; Q/K/V pair slices come from the fused QKV buffer via column-block
# index maps (qkv passed three times). Q.K^T via dot_general (no k.T XLU
# transpose); a single unmasked 128-lane store per step.
# ----------------------------------------------------------------------------
def _attention_kernel(q_ref, k_ref, v_ref, m_ref, o_ref, *, hd, scale):
    q = q_ref[0]                                  # (S, 2*hd) bf16
    k = k_ref[0]                                  # (S, 2*hd) bf16
    v = v_ref[0]                                  # (S, 2*hd) bf16
    mask = m_ref[0].astype(jnp.float32)           # (1, S), 1.0 = attend
    bias = (1.0 - mask) * (-1e9)                  # additive key bias

    outs = []
    for h in range(2):                            # the two heads in the pair
        qh = q[:, h * hd:(h + 1) * hd]
        kh = k[:, h * hd:(h + 1) * hd]
        vh = v[:, h * hd:(h + 1) * hd]
        # Contract on the last dims directly -> no materialized k.T.
        s = jax.lax.dot_general(qh, kh, (((1,), (1,)), ((), ())),
                                preferred_element_type=jnp.float32) * scale
        s = s + bias                              # broadcast over query rows
        s_max = jnp.max(s, axis=-1, keepdims=True)
        p = jnp.exp(s - s_max)
        p = p * pl.reciprocal(jnp.sum(p, axis=-1, keepdims=True), approx=True)
        outs.append(jnp.dot(p.astype(v.dtype), vh,
                            preferred_element_type=jnp.float32))
    # One 128-lane-wide unmasked store (only 2 head contexts ever live).
    o_ref[0] = jnp.concatenate(outs, axis=-1).astype(o_ref.dtype)


def pallas_attention(qkv, mask_f, *, num_heads, head_dim):
    B, S, H3 = qkv.shape
    H = H3 // 3
    assert num_heads % 2 == 0 and 2 * head_dim == 128, \
        "attention kernel assumes head_dim=64 and an even number of heads"
    npairs = num_heads // 2
    pw = 2 * head_dim                             # 128-lane head pair
    return pl.pallas_call(
        functools.partial(_attention_kernel, hd=head_dim,
                          scale=1.0 / math.sqrt(head_dim)),
        out_shape=jax.ShapeDtypeStruct((B, S, H), qkv.dtype),
        grid=(B, npairs),
        in_specs=[
            pl.BlockSpec((1, S, pw), lambda b, p: (b, 0, p)),               # Q pair
            pl.BlockSpec((1, S, pw), lambda b, p: (b, 0, npairs + p)),      # K pair
            pl.BlockSpec((1, S, pw), lambda b, p: (b, 0, 2 * npairs + p)),  # V pair
            pl.BlockSpec((1, 1, S), lambda b, p: (b, 0, 0)),                # mask
        ],
        out_specs=pl.BlockSpec((1, S, pw), lambda b, p: (b, 0, p)),
        compiler_params=pltpu.CompilerParams(
            dimension_semantics=("parallel", "parallel"),
            vmem_limit_bytes=VMEM_LIMIT),
    )(qkv, qkv, qkv, mask_f.reshape(B, 1, S))


# ----------------------------------------------------------------------------
# Synthetic, deterministic parameters
# ----------------------------------------------------------------------------
def init_params(key, cfg):
    # TODO(synk): pretrained KoBERT weights / SentencePiece vocab are replaced
    # by deterministic synthetic parameters.
    H = cfg["hidden_size"]
    I = cfg["intermediate_size"]
    Tp = cfg["num_classes_padded"]
    std = 0.02
    keys = iter(jax.random.split(key, 512))

    def nrm(shape, dtype=jnp.float32):
        return (std * jax.random.normal(next(keys), shape)).astype(dtype)

    params = {
        "word_emb": nrm((cfg["vocab_size"], H)),
        "pos_emb": nrm((cfg["max_position_embeddings"], H)),
        "type_emb": nrm((cfg["type_vocab_size"], H)),
        "emb_ln_g": jnp.ones((H,), jnp.float32),
        "emb_ln_b": jnp.zeros((H,), jnp.float32),
        "layers": [],
        # position_wise_ff head, padded to a lane-dense 128-wide output
        "ff_w": nrm((H, Tp), jnp.bfloat16),
        "ff_b": jnp.zeros((Tp,), jnp.float32),
    }
    for _ in range(cfg["num_hidden_layers"]):
        params["layers"].append({
            "w_qkv": nrm((H, 3 * H), jnp.bfloat16),   # fused Q|K|V
            "b_qkv": jnp.zeros((3 * H,), jnp.float32),
            "wo": nrm((H, H), jnp.bfloat16),
            "bo": jnp.zeros((H,), jnp.float32),
            "ln1_g": jnp.ones((H,), jnp.float32),
            "ln1_b": jnp.zeros((H,), jnp.float32),
            "wi": nrm((H, I), jnp.bfloat16),
            "bi": jnp.zeros((I,), jnp.float32),
            "wo2": nrm((I, H), jnp.bfloat16),
            "bo2": jnp.zeros((H,), jnp.float32),
            "ln2_g": jnp.ones((H,), jnp.float32),
            "ln2_b": jnp.zeros((H,), jnp.float32),
        })
    return params


# ----------------------------------------------------------------------------
# Forward pass (glue + Pallas kernels) -> logits, like the PyTorch module
# ----------------------------------------------------------------------------
def kobert_forward(params, cfg, input_ids, token_type_ids=None):
    B, S = input_ids.shape
    H = cfg["hidden_size"]
    nh, hd = cfg["num_heads"], cfg["head_dim"]
    T = cfg["num_classes"]

    if token_type_ids is None:
        token_type_ids = jnp.zeros_like(input_ids)

    # attention_mask = input_ids.ne(padding_token).float()
    attention_mask = (input_ids != cfg["pad_token_id"]).astype(jnp.float32)

    # Embeddings (gathers are plain JAX glue); sum cast to bf16 before the
    # memory-bound LayerNorm kernel (LN recomputes stats in f32 internally).
    pos_ids = jnp.arange(S, dtype=jnp.int32)[None, :]
    emb = (params["word_emb"][input_ids]
           + params["pos_emb"][pos_ids]
           + params["type_emb"][token_type_ids]).astype(jnp.bfloat16)
    x2 = pallas_layernorm(emb.reshape(B * S, H),
                          params["emb_ln_g"], params["emb_ln_b"])   # bf16 (M,H)
    # TODO(synk): dropout layers are identity (inference semantics).

    for layer in params["layers"]:
        # Fused Q|K|V projection: one kernel launch, 3x wider MXU N.
        qkv = pallas_linear(x2, layer["w_qkv"], layer["b_qkv"])          # (M,3H)
        ctx = pallas_attention(qkv.reshape(B, S, 3 * H), attention_mask,
                               num_heads=nh, head_dim=hd)                # (B,S,H)
        # Output projection with bias + residual + LayerNorm fused epilogue.
        x2 = pallas_linear_res_ln(ctx.reshape(B * S, H), layer["wo"],
                                  layer["bo"], x2,
                                  layer["ln1_g"], layer["ln1_b"])
        inter = pallas_linear(x2, layer["wi"], layer["bi"], act="gelu")  # (M,I)
        x2 = pallas_linear_res_ln(inter, layer["wo2"], layer["bo2"], x2,
                                  layer["ln2_g"], layer["ln2_b"])

    # position_wise_ff: lane-dense (128-wide) head, slice back to num_classes.
    logits_pad = pallas_linear(x2, params["ff_w"], params["ff_b"],
                               out_dtype=jnp.float32)                    # (M,128)
    logits = logits_pad[:, :T].reshape(B, S, T)
    return logits


# ----------------------------------------------------------------------------
if __name__ == "__main__":
    cfg = dict(
        vocab_size=100,
        hidden_size=128,
        num_hidden_layers=2,
        num_heads=2,
        head_dim=64,
        intermediate_size=256,
        max_position_embeddings=64,
        type_vocab_size=2,
        num_classes=8,
        num_classes_padded=128,   # lane-dense classifier output, sliced to 8
        pad_token_id=0,
    )
    B, S = 2, 16

    key = jax.random.PRNGKey(0)
    pkey, ikey = jax.random.split(key)
    params = init_params(pkey, cfg)

    input_ids = jax.random.randint(ikey, (B, S), 1, cfg["vocab_size"],
                                   dtype=jnp.int32)
    input_ids = input_ids.at[1, 12:].set(0)     # padding in 2nd batch element
    token_type_ids = jnp.zeros((B, S), jnp.int32)

    fwd = jax.jit(lambda p, ids, tt: kobert_forward(p, cfg, ids, tt))
    logits = fwd(params, input_ids, token_type_ids)
    jax.block_until_ready(logits)

    assert logits.shape == (B, S, cfg["num_classes"])
    assert np.all(np.isfinite(np.asarray(logits, dtype=np.float32)))
    print("KERNEL_OK")
</pallas_src>

<mosaic_0001>
module attributes {stable_mosaic.version = 11 : i64} {
  func.func @_layernorm_kernel(%arg0: i32, %arg1: memref<32x128xbf16, #tpu.memory_space<vmem>>, %arg2: memref<1x128xf32, #tpu.memory_space<vmem>>, %arg3: memref<1x128xf32, #tpu.memory_space<vmem>>, %arg4: memref<32x128xbf16, #tpu.memory_space<vmem>>) attributes {dimension_semantics = [#tpu.dimension_semantics<parallel>], iteration_bounds = array<i64: 1>, scalar_prefetch = 0 : i64, scratch_operands = 0 : i64, tpu.core_type = #tpu.core_type<tc>, window_params = [{transform_indices = @transform_0, window_bounds = array<i64: 32, 128>}, {pipeline_mode = #tpu.pipeline_mode<synchronous>, transform_indices = @transform_1, window_bounds = array<i64: 1, 128>}, {pipeline_mode = #tpu.pipeline_mode<synchronous>, transform_indices = @transform_2, window_bounds = array<i64: 1, 128>}, {transform_indices = @transform_3, window_bounds = array<i64: 32, 128>}]} {
    %c0 = arith.constant 0 : index
    %c0_0 = arith.constant 0 : index
    %0 = vector.load %arg1[%c0, %c0_0] : memref<32x128xbf16, #tpu.memory_space<vmem>>, vector<32x128xbf16>
    %1 = arith.extf %0 : vector<32x128xbf16> to vector<32x128xf32>
    %cst = arith.constant dense<0.000000e+00> : vector<32xf32>
    %2 = vector.multi_reduction <add>, %1, %cst [1] : vector<32x128xf32> to vector<32xf32>
    %3 = vector.shape_cast %2 : vector<32xf32> to vector<32x1xf32>
    %cst_1 = arith.constant 1.280000e+02 : f32
    %4 = vector.broadcast %cst_1 : f32 to vector<32x1xf32>
    %5 = arith.divf %3, %4 : vector<32x1xf32>
    %6 = vector.broadcast %5 : vector<32x1xf32> to vector<32x128xf32>
    %7 = arith.subf %1, %6 : vector<32x128xf32>
    %8 = arith.mulf %7, %7 : vector<32x128xf32>
    %cst_2 = arith.constant dense<0.000000e+00> : vector<32xf32>
    %9 = vector.multi_reduction <add>, %8, %cst_2 [1] : vector<32x128xf32> to vector<32xf32>
    %10 = vector.shape_cast %9 : vector<32xf32> to vector<32x1xf32>
    %cst_3 = arith.constant 1.280000e+02 : f32
    %11 = vector.broadcast %cst_3 : f32 to vector<32x1xf32>
    %12 = arith.divf %10, %11 : vector<32x1xf32>
    %13 = vector.broadcast %5 : vector<32x1xf32> to vector<32x128xf32>
    %14 = arith.subf %1, %13 : vector<32x128xf32>
    %cst_4 = arith.constant 9.99999996E-13 : f32
    %15 = vector.broadcast %cst_4 : f32 to vector<32x1xf32>
    %16 = arith.addf %12, %15 : vector<32x1xf32>
    %17 = math.rsqrt %16 : vector<32x1xf32>
    %18 = vector.broadcast %17 : vector<32x1xf32> to vector<32x128xf32>
    %19 = arith.mulf %14, %18 : vector<32x128xf32>
    %c0_5 = arith.constant 0 : index
    %c0_6 = arith.constant 0 : index
    %20 = vector.load %arg2[%c0_5, %c0_6] : memref<1x128xf32, #tpu.memory_space<vmem>>, vector<1x128xf32>
    %21 = vector.broadcast %20 : vector<1x128xf32> to vector<32x128xf32>
    %22 = arith.mulf %19, %21 : vector<32x128xf32>
    %c0_7 = arith.constant 0 : index
    %c0_8 = arith.constant 0 : index
    %23 = vector.load %arg3[%c0_7, %c0_8] : memref<1x128xf32, #tpu.memory_space<vmem>>, vector<1x128xf32>
    %24 = vector.broadcast %23 : vector<1x128xf32> to vector<32x128xf32>
    %25 = arith.addf %22, %24 : vector<32x128xf32>
    %26 = arith.truncf %25 : vector<32x128xf32> to vector<32x128xbf16>
    %c0_9 = arith.constant 0 : index
    %c0_10 = arith.constant 0 : index
    %27 = vector.load %arg4[%c0_9, %c0_10] : memref<32x128xbf16, #tpu.memory_space<vmem>>, vector<32x128xbf16>
    tpu.vector_store %arg4[%c0_9, %c0_10], %26 {strides = array<i32>} : memref<32x128xbf16, #tpu.memory_space<vmem>>, vector<32x128xbf16>,
    return
  }
  func.func @transform_0(%arg0: i32) -> (i32, i32) {
    %c0_i32 = arith.constant 0 : i32
    %c0_i32_0 = arith.constant 0 : i32
    return %arg0, %c0_i32 : i32, i32
  }
  func.func @transform_1(%arg0: i32) -> (i32, i32) {
    %c0_i32 = arith.constant 0 : i32
    %c0_i32_0 = arith.constant 0 : i32
    %c0_i32_1 = arith.constant 0 : i32
    return %c0_i32, %c0_i32_0 : i32, i32
  }
  func.func @transform_2(%arg0: i32) -> (i32, i32) {
    %c0_i32 = arith.constant 0 : i32
    %c0_i32_0 = arith.constant 0 : i32
    %c0_i32_1 = arith.constant 0 : i32
    return %c0_i32, %c0_i32_0 : i32, i32
  }
  func.func @transform_3(%arg0: i32) -> (i32, i32) {
    %c0_i32 = arith.constant 0 : i32
    %c0_i32_0 = arith.constant 0 : i32
    return %arg0, %c0_i32 : i32, i32
  }
}

module attributes {stable_mosaic.version = 11 : i64} {
  func.func @_linear_kernel(%arg0: i32, %arg1: i32, %arg2: i32, %arg3: memref<32x128xbf16, #tpu.memory_space<vmem>>, %arg4: memref<128x384xbf16, #tpu.memory_space<vmem>>, %arg5: memref<1x384xf32, #tpu.memory_space<vmem>>, %arg6: memref<32x384xbf16, #tpu.memory_space<vmem>>, %arg7: memref<32x384xf32, #tpu.memory_space<vmem>>) attributes {dimension_semantics = [#tpu.dimension_semantics<parallel>, #tpu.dimension_semantics<parallel>, #tpu.dimension_semantics<arbitrary>], iteration_bounds = array<i64: 1, 1, 1>, scalar_prefetch = 0 : i64, scratch_operands = 1 : i64, tpu.core_type = #tpu.core_type<tc>, window_params = [{transform_indices = @transform_0, window_bounds = array<i64: 32, 128>}, {transform_indices = @transform_1, window_bounds = array<i64: 128, 384>}, {transform_indices = @transform_2, window_bounds = array<i64: 1, 384>}, {transform_indices = @transform_3, window_bounds = array<i64: 32, 384>}]} {
    %c0_i32 = arith.constant 0 : i32
    %0 = arith.cmpi eq, %arg2, %c0_i32 : i32
    %1 = arith.extui %0 : i1 to i32
    %c0_i32_0 = arith.constant 0 : i32
    %2 = arith.cmpi ne, %1, %c0_i32_0 : i32
    scf.if %2 {
      %cst_10 = arith.constant 0.000000e+00 : f32
      %12 = vector.broadcast %cst_10 : f32 to vector<32x384xf32>
      %c0_11 = arith.constant 0 : index
      %c0_12 = arith.constant 0 : index
      %13 = vector.load %arg7[%c0_11, %c0_12] : memref<32x384xf32, #tpu.memory_space<vmem>>, vector<32x384xf32>
      tpu.vector_store %arg7[%c0_11, %c0_12], %12 {strides = array<i32>} : memref<32x384xf32, #tpu.memory_space<vmem>>, vector<32x384xf32>,
    } else {
    }
    %c0 = arith.constant 0 : index
    %c0_1 = arith.constant 0 : index
    %3 = vector.load %arg7[%c0, %c0_1] : memref<32x384xf32, #tpu.memory_space<vmem>>, vector<32x384xf32>
    %c0_2 = arith.constant 0 : index
    %c0_3 = arith.constant 0 : index
    %4 = vector.load %arg3[%c0_2, %c0_3] : memref<32x128xbf16, #tpu.memory_space<vmem>>, vector<32x128xbf16>
    %c0_4 = arith.constant 0 : index
    %c0_5 = arith.constant 0 : index
    %5 = vector.load %arg4[%c0_4, %c0_5] : memref<128x384xbf16, #tpu.memory_space<vmem>>, vector<128x384xbf16>
    %cst = arith.constant dense<0.000000e+00> : vector<32x384xf32>
    %6 = tpu.matmul %4, %5, %cst {dimension_numbers = #tpu.dot_dimension_numbers<[1], [0], [0], [1], [0, 0, 1, 1], [], []>} : vector<32x128xbf16>, vector<128x384xbf16>, vector<32x384xf32> -> vector<32x384xf32>
    %7 = arith.addf %3, %6 : vector<32x384xf32>
    %c0_6 = arith.constant 0 : index
    %c0_7 = arith.constant 0 : index
    %8 = vector.load %arg7[%c0_6, %c0_7] : memref<32x384xf32, #tpu.memory_space<vmem>>, vector<32x384xf32>
    tpu.vector_store %arg7[%c0_6, %c0_7], %7 {strides = array<i32>} : memref<32x384xf32, #tpu.memory_space<vmem>>, vector<32x384xf32>,
    %c0_i32_8 = arith.constant 0 : i32
    %9 = arith.cmpi eq, %arg2, %c0_i32_8 : i32
    %10 = arith.extui %9 : i1 to i32
    %c0_i32_9 = arith.constant 0 : i32
    %11 = arith.cmpi ne, %10, %c0_i32_9 : i32
    scf.if %11 {
      %c0_10 = arith.constant 0 : index
      %c0_11 = arith.constant 0 : index
      %12 = vector.load %arg7[%c0_10, %c0_11] : memref<32x384xf32, #tpu.memory_space<vmem>>, vector<32x384xf32>
      %c0_12 = arith.constant 0 : index
      %c0_13 = arith.constant 0 : index
      %13 = vector.load %arg5[%c0_12, %c0_13] : memref<1x384xf32, #tpu.memory_space<vmem>>, vector<1x384xf32>
      %14 = vector.broadcast %13 : vector<1x384xf32> to vector<32x384xf32>
      %15 = arith.addf %12, %14 : vector<32x384xf32>
      %16 = arith.truncf %15 : vector<32x384xf32> to vector<32x384xbf16>
      %c0_14 = arith.constant 0 : index
      %c0_15 = arith.constant 0 : index
      %17 = vector.load %arg6[%c0_14, %c0_15] : memref<32x384xbf16, #tpu.memory_space<vmem>>, vector<32x384xbf16>
      tpu.vector_store %arg6[%c0_14, %c0_15], %16 {strides = array<i32>} : memref<32x384xbf16, #tpu.memory_space<vmem>>, vector<32x384xbf16>,
    } else {
    }
    return
  }
  func.func @transform_0(%arg0: i32, %arg1: i32, %arg2: i32) -> (i32, i32) {
    %c0_i32 = arith.constant 0 : i32
    return %arg0, %arg2 : i32, i32
  }
  func.func @transform_1(%arg0: i32, %arg1: i32, %arg2: i32) -> (i32, i32) {
    %c0_i32 = arith.constant 0 : i32
    return %arg2, %arg1 : i32, i32
  }
  func.func @transform_2(%arg0: i32, %arg1: i32, %arg2: i32) -> (i32, i32) {
    %c0_i32 = arith.constant 0 : i32
    %c0_i32_0 = arith.constant 0 : i32
    return %c0_i32, %arg1 : i32, i32
  }
  func.func @transform_3(%arg0: i32, %arg1: i32, %arg2: i32) -> (i32, i32) {
    %c0_i32 = arith.constant 0 : i32
    return %arg0, %arg1 : i32, i32
  }
}

module attributes {stable_mosaic.version = 11 : i64} {
  func.func @_attention_kernel(%arg0: i32, %arg1: i32, %arg2: memref<1x16x128xbf16, #tpu.memory_space<vmem>>, %arg3: memref<1x16x128xbf16, #tpu.memory_space<vmem>>, %arg4: memref<1x16x128xbf16, #tpu.memory_space<vmem>>, %arg5: memref<1x1x16xf32, #tpu.memory_space<vmem>>, %arg6: memref<1x16x128xbf16, #tpu.memory_space<vmem>>) attributes {dimension_semantics = [#tpu.dimension_semantics<parallel>, #tpu.dimension_semantics<parallel>], iteration_bounds = array<i64: 2, 1>, scalar_prefetch = 0 : i64, scratch_operands = 0 : i64, tpu.core_type = #tpu.core_type<tc>, window_params = [{transform_indices = @transform_0, window_bounds = array<i64: 1, 16, 128>}, {transform_indices = @transform_1, window_bounds = array<i64: 1, 16, 128>}, {transform_indices = @transform_2, window_bounds = array<i64: 1, 16, 128>}, {transform_indices = @transform_3, window_bounds = array<i64: 1, 1, 16>}, {transform_indices = @transform_4, window_bounds = array<i64: 1, 16, 128>}]} {
    %c0 = arith.constant 0 : index
    %c0_0 = arith.constant 0 : index
    %c0_1 = arith.constant 0 : index
    %0 = vector.load %arg2[%c0, %c0_0, %c0_1] : memref<1x16x128xbf16, #tpu.memory_space<vmem>>, vector<1x16x128xbf16>
    %1 = vector.shape_cast %0 : vector<1x16x128xbf16> to vector<16x128xbf16>
    %c0_2 = arith.constant 0 : index
    %c0_3 = arith.constant 0 : index
    %c0_4 = arith.constant 0 : index
    %2 = vector.load %arg3[%c0_2, %c0_3, %c0_4] : memref<1x16x128xbf16, #tpu.memory_space<vmem>>, vector<1x16x128xbf16>
    %3 = vector.shape_cast %2 : vector<1x16x128xbf16> to vector<16x128xbf16>
    %c0_5 = arith.constant 0 : index
    %c0_6 = arith.constant 0 : index
    %c0_7 = arith.constant 0 : index
    %4 = vector.load %arg4[%c0_5, %c0_6, %c0_7] : memref<1x16x128xbf16, #tpu.memory_space<vmem>>, vector<1x16x128xbf16>
    %5 = vector.shape_cast %4 : vector<1x16x128xbf16> to vector<16x128xbf16>
    %c0_8 = arith.constant 0 : index
    %c0_9 = arith.constant 0 : index
    %c0_10 = arith.constant 0 : index
    %6 = vector.load %arg5[%c0_8, %c0_9, %c0_10] : memref<1x1x16xf32, #tpu.memory_space<vmem>>, vector<1x1x16xf32>
    %7 = vector.shape_cast %6 : vector<1x1x16xf32> to vector<1x16xf32>
    %cst = arith.constant 1.000000e+00 : f32
    %8 = vector.broadcast %cst : f32 to vector<1x16xf32>
    %9 = arith.subf %8, %7 : vector<1x16xf32>
    %cst_11 = arith.constant -1.000000e+09 : f32
    %10 = vector.broadcast %cst_11 : f32 to vector<1x16xf32>
    %11 = arith.mulf %9, %10 : vector<1x16xf32>
    %12 = vector.extract_strided_slice %1 {offsets = [0, 0], sizes = [16, 64], strides = [1, 1]} : vector<16x128xbf16> to vector<16x64xbf16>
    %13 = vector.extract_strided_slice %3 {offsets = [0, 0], sizes = [16, 64], strides = [1, 1]} : vector<16x128xbf16> to vector<16x64xbf16>
    %14 = vector.extract_strided_slice %5 {offsets = [0, 0], sizes = [16, 64], strides = [1, 1]} : vector<16x128xbf16> to vector<16x64xbf16>
    %cst_12 = arith.constant dense<0.000000e+00> : vector<16x16xf32>
    %15 = tpu.matmul %12, %13, %cst_12 {dimension_numbers = #tpu.dot_dimension_numbers<[1], [1], [0], [0], [0, 0, 1, 0], [], []>} : vector<16x64xbf16>, vector<16x64xbf16>, vector<16x16xf32> -> vector<16x16xf32>
    %cst_13 = arith.constant 1.250000e-01 : f32
    %16 = vector.broadcast %cst_13 : f32 to vector<16x16xf32>
    %17 = arith.mulf %15, %16 : vector<16x16xf32>
    %18 = vector.broadcast %11 : vector<1x16xf32> to vector<16x16xf32>
    %19 = arith.addf %17, %18 : vector<16x16xf32>
    %cst_14 = arith.constant dense<0xFF800000> : vector<16xf32>
    %20 = vector.multi_reduction <maximumf>, %19, %cst_14 [1] : vector<16x16xf32> to vector<16xf32>
    %21 = vector.shape_cast %20 : vector<16xf32> to vector<16x1xf32>
    %22 = vector.broadcast %21 : vector<16x1xf32> to vector<16x16xf32>
    %23 = arith.subf %19, %22 : vector<16x16xf32>
    %24 = math.exp %23 : vector<16x16xf32>
    %cst_15 = arith.constant dense<0.000000e+00> : vector<16xf32>
    %25 = vector.multi_reduction <add>, %24, %cst_15 [1] : vector<16x16xf32> to vector<16xf32>
    %26 = vector.shape_cast %25 : vector<16xf32> to vector<16x1xf32>
    %27 = tpu.reciprocal %26 {approx = true} : vector<16x1xf32> -> vector<16x1xf32>
    %28 = vector.broadcast %27 : vector<16x1xf32> to vector<16x16xf32>
    %29 = arith.mulf %24, %28 : vector<16x16xf32>
    %30 = arith.truncf %29 : vector<16x16xf32> to vector<16x16xbf16>
    %cst_16 = arith.constant dense<0.000000e+00> : vector<16x64xf32>
    %31 = tpu.matmul %30, %14, %cst_16 {dimension_numbers = #tpu.dot_dimension_numbers<[1], [0], [0], [1], [0, 0, 1, 1], [], []>} : vector<16x16xbf16>, vector<16x64xbf16>, vector<16x64xf32> -> vector<16x64xf32>
    %32 = vector.extract_strided_slice %1 {offsets = [0, 64], sizes = [16, 64], strides = [1, 1]} : vector<16x128xbf16> to vector<16x64xbf16>
    %33 = vector.extract_strided_slice %3 {offsets = [0, 64], sizes = [16, 64], strides = [1, 1]} : vector<16x128xbf16> to vector<16x64xbf16>
    %34 = vector.extract_strided_slice %5 {offsets = [0, 64], sizes = [16, 64], strides = [1, 1]} : vector<16x128xbf16> to vector<16x64xbf16>
    %cst_17 = arith.constant dense<0.000000e+00> : vector<16x16xf32>
    %35 = tpu.matmul %32, %33, %cst_17 {dimension_numbers = #tpu.dot_dimension_numbers<[1], [1], [0], [0], [0, 0, 1, 0], [], []>} : vector<16x64xbf16>, vector<16x64xbf16>, vector<16x16xf32> -> vector<16x16xf32>
    %cst_18 = arith.constant 1.250000e-01 : f32
    %36 = vector.broadcast %cst_18 : f32 to vector<16x16xf32>
    %37 = arith.mulf %35, %36 : vector<16x16xf32>
    %38 = vector.broadcast %11 : vector<1x16xf32> to vector<16x16xf32>
    %39 = arith.addf %37, %38 : vector<16x16xf32>
    %cst_19 = arith.constant dense<0xFF800000> : vector<16xf32>
    %40 = vector.multi_reduction <maximumf>, %39, %cst_19 [1] : vector<16x16xf32> to vector<16xf32>
    %41 = vector.shape_cast %40 : vector<16xf32> to vector<16x1xf32>
    %42 = vector.broadcast %41 : vector<16x1xf32> to vector<16x16xf32>
    %43 = arith.subf %39, %42 : vector<16x16xf32>
    %44 = math.exp %43 : vector<16x16xf32>
    %cst_20 = arith.constant dense<0.000000e+00> : vector<16xf32>
    %45 = vector.multi_reduction <add>, %44, %cst_20 [1] : vector<16x16xf32> to vector<16xf32>
    %46 = vector.shape_cast %45 : vector<16xf32> to vector<16x1xf32>
    %47 = tpu.reciprocal %46 {approx = true} : vector<16x1xf32> -> vector<16x1xf32>
    %48 = vector.broadcast %47 : vector<16x1xf32> to vector<16x16xf32>
    %49 = arith.mulf %44, %48 : vector<16x16xf32>
    %50 = arith.truncf %49 : vector<16x16xf32> to vector<16x16xbf16>
    %cst_21 = arith.constant dense<0.000000e+00> : vector<16x64xf32>
    %51 = tpu.matmul %50, %34, %cst_21 {dimension_numbers = #tpu.dot_dimension_numbers<[1], [0], [0], [1], [0, 0, 1, 1], [], []>} : vector<16x16xbf16>, vector<16x64xbf16>, vector<16x64xf32> -> vector<16x64xf32>
    %52 = tpu.concatenate %31, %51 in 1 : vector<16x64xf32>, vector<16x64xf32> -> vector<16x128xf32>
    %53 = arith.truncf %52 : vector<16x128xf32> to vector<16x128xbf16>
    %c0_22 = arith.constant 0 : index
    %c0_23 = arith.constant 0 : index
    %c0_24 = arith.constant 0 : index
    %54 = vector.load %arg6[%c0_22, %c0_23, %c0_24] : memref<1x16x128xbf16, #tpu.memory_space<vmem>>, vector<1x16x128xbf16>
    %55 = vector.shape_cast %54 : vector<1x16x128xbf16> to vector<16x128xbf16>
    %56 = vector.shape_cast %53 : vector<16x128xbf16> to vector<1x16x128xbf16>
    tpu.vector_store %arg6[%c0_22, %c0_23, %c0_24], %56 {strides = array<i32>} : memref<1x16x128xbf16, #tpu.memory_space<vmem>>, vector<1x16x128xbf16>,
    return
  }
  func.func @transform_0(%arg0: i32, %arg1: i32) -> (i32, i32, i32) {
    %c0_i32 = arith.constant 0 : i32
    %c0_i32_0 = arith.constant 0 : i32
    return %arg0, %c0_i32, %arg1 : i32, i32, i32
  }
  func.func @transform_1(%arg0: i32, %arg1: i32) -> (i32, i32, i32) {
    %c1_i32 = arith.constant 1 : i32
    %0 = arith.addi %c1_i32, %arg1 : i32
    %c0_i32 = arith.constant 0 : i32
    %c0_i32_0 = arith.constant 0 : i32
    return %arg0, %c0_i32, %0 : i32, i32, i32
  }
  func.func @transform_2(%arg0: i32, %arg1: i32) -> (i32, i32, i32) {
    %c2_i32 = arith.constant 2 : i32
    %0 = arith.addi %c2_i32, %arg1 : i32
    %c0_i32 = arith.constant 0 : i32
    %c0_i32_0 = arith.constant 0 : i32
    return %arg0, %c0_i32, %0 : i32, i32, i32
  }
  func.func @transform_3(%arg0: i32, %arg1: i32) -> (i32, i32, i32) {
    %c0_i32 = arith.constant 0 : i32
    %c0_i32_0 = arith.constant 0 : i32
    %c0_i32_1 = arith.constant 0 : i32
    return %arg0, %c0_i32, %c0_i32_0 : i32, i32, i32
  }
  func.func @transform_4(%arg0: i32, %arg1: i32) -> (i32, i32, i32) {
    %c0_i32 = arith.constant 0 : i32
    %c0_i32_0 = arith.constant 0 : i32
    return %arg0, %c0_i32, %arg1 : i32, i32, i32
  }
}

module attributes {stable_mosaic.version = 11 : i64} {
  func.func @_linear_res_ln_kernel(%arg0: i32, %arg1: i32, %arg2: memref<32x128xbf16, #tpu.memory_space<vmem>>, %arg3: memref<128x128xbf16, #tpu.memory_space<vmem>>, %arg4: memref<1x128xf32, #tpu.memory_space<vmem>>, %arg5: memref<32x128xbf16, #tpu.memory_space<vmem>>, %arg6: memref<1x128xf32, #tpu.memory_space<vmem>>, %arg7: memref<1x128xf32, #tpu.memory_space<vmem>>, %arg8: memref<32x128xbf16, #tpu.memory_space<vmem>>, %arg9: memref<32x128xf32, #tpu.memory_space<vmem>>) attributes {dimension_semantics = [#tpu.dimension_semantics<parallel>, #tpu.dimension_semantics<arbitrary>], iteration_bounds = array<i64: 1, 1>, scalar_prefetch = 0 : i64, scratch_operands = 1 : i64, tpu.core_type = #tpu.core_type<tc>, window_params = [{transform_indices = @transform_0, window_bounds = array<i64: 32, 128>}, {transform_indices = @transform_1, window_bounds = array<i64: 128, 128>}, {pipeline_mode = #tpu.pipeline_mode<synchronous>, transform_indices = @transform_2, window_bounds = array<i64: 1, 128>}, {transform_indices = @transform_3, window_bounds = array<i64: 32, 128>}, {pipeline_mode = #tpu.pipeline_mode<synchronous>, transform_indices = @transform_4, window_bounds = array<i64: 1, 128>}, {pipeline_mode = #tpu.pipeline_mode<synchronous>, transform_indices = @transform_5, window_bounds = array<i64: 1, 128>}, {transform_indices = @transform_6, window_bounds = array<i64: 32, 128>}]} {
    %c0_i32 = arith.constant 0 : i32
    %0 = arith.cmpi eq, %arg1, %c0_i32 : i32
    %1 = arith.extui %0 : i1 to i32
    %c0_i32_0 = arith.constant 0 : i32
    %2 = arith.cmpi ne, %1, %c0_i32_0 : i32
    scf.if %2 {
      %cst_10 = arith.constant 0.000000e+00 : f32
      %12 = vector.broadcast %cst_10 : f32 to vector<32x128xf32>
      %c0_11 = arith.constant 0 : index
      %c0_12 = arith.constant 0 : index
      %13 = vector.load %arg9[%c0_11, %c0_12] : memref<32x128xf32, #tpu.memory_space<vmem>>, vector<32x128xf32>
      tpu.vector_store %arg9[%c0_11, %c0_12], %12 {strides = array<i32>} : memref<32x128xf32, #tpu.memory_space<vmem>>, vector<32x128xf32>,
    } else {
    }
    %c0 = arith.constant 0 : index
    %c0_1 = arith.constant 0 : index
    %3 = vector.load %arg9[%c0, %c0_1] : memref<32x128xf32, #tpu.memory_space<vmem>>, vector<32x128xf32>
    %c0_2 = arith.constant 0 : index
    %c0_3 = arith.constant 0 : index
    %4 = vector.load %arg2[%c0_2, %c0_3] : memref<32x128xbf16, #tpu.memory_space<vmem>>, vector<32x128xbf16>
    %c0_4 = arith.constant 0 : index
    %c0_5 = arith.constant 0 : index
    %5 = vector.load %arg3[%c0_4, %c0_5] : memref<128x128xbf16, #tpu.memory_space<vmem>>, vector<128x128xbf16>
    %cst = arith.constant dense<0.000000e+00> : vector<32x128xf32>
    %6 = tpu.matmul %4, %5, %cst {dimension_numbers = #tpu.dot_dimension_numbers<[1], [0], [0], [1], [0, 0, 1, 1], [], []>} : vector<32x128xbf16>, vector<128x128xbf16>, vector<32x128xf32> -> vector<32x128xf32>
    %7 = arith.addf %3, %6 : vector<32x128xf32>
    %c0_6 = arith.constant 0 : index
    %c0_7 = arith.constant 0 : index
    %8 = vector.load %arg9[%c0_6, %c0_7] : memref<32x128xf32, #tpu.memory_space<vmem>>, vector<32x128xf32>
    tpu.vector_store %arg9[%c0_6, %c0_7], %7 {strides = array<i32>} : memref<32x128xf32, #tpu.memory_space<vmem>>, vector<32x128xf32>,
    %c0_i32_8 = arith.constant 0 : i32
    %9 = arith.cmpi eq, %arg1, %c0_i32_8 : i32
    %10 = arith.extui %9 : i1 to i32
    %c0_i32_9 = arith.constant 0 : i32
    %11 = arith.cmpi ne, %10, %c0_i32_9 : i32
    scf.if %11 {
      %c0_10 = arith.constant 0 : index
      %c0_11 = arith.constant 0 : index
      %12 = vector.load %arg9[%c0_10, %c0_11] : memref<32x128xf32, #tpu.memory_space<vmem>>, vector<32x128xf32>
      %c0_12 = arith.constant 0 : index
      %c0_13 = arith.constant 0 : index
      %13 = vector.load %arg4[%c0_12, %c0_13] : memref<1x128xf32, #tpu.memory_space<vmem>>, vector<1x128xf32>
      %14 = vector.broadcast %13 : vector<1x128xf32> to vector<32x128xf32>
      %15 = arith.addf %12, %14 : vector<32x128xf32>
      %c0_14 = arith.constant 0 : index
      %c0_15 = arith.constant 0 : index
      %16 = vector.load %arg5[%c0_14, %c0_15] : memref<32x128xbf16, #tpu.memory_space<vmem>>, vector<32x128xbf16>
      %17 = arith.extf %16 : vector<32x128xbf16> to vector<32x128xf32>
      %18 = arith.addf %15, %17 : vector<32x128xf32>
      %cst_16 = arith.constant dense<0.000000e+00> : vector<32xf32>
      %19 = vector.multi_reduction <add>, %18, %cst_16 [1] : vector<32x128xf32> to vector<32xf32>
      %20 = vector.shape_cast %19 : vector<32xf32> to vector<32x1xf32>
      %cst_17 = arith.constant 1.280000e+02 : f32
      %21 = vector.broadcast %cst_17 : f32 to vector<32x1xf32>
      %22 = arith.divf %20, %21 : vector<32x1xf32>
      %23 = vector.broadcast %22 : vector<32x1xf32> to vector<32x128xf32>
      %24 = arith.subf %18, %23 : vector<32x128xf32>
      %25 = arith.mulf %24, %24 : vector<32x128xf32>
      %cst_18 = arith.constant dense<0.000000e+00> : vector<32xf32>
      %26 = vector.multi_reduction <add>, %25, %cst_18 [1] : vector<32x128xf32> to vector<32xf32>
      %27 = vector.shape_cast %26 : vector<32xf32> to vector<32x1xf32>
      %cst_19 = arith.constant 1.280000e+02 : f32
      %28 = vector.broadcast %cst_19 : f32 to vector<32x1xf32>
      %29 = arith.divf %27, %28 : vector<32x1xf32>
      %30 = vector.broadcast %22 : vector<32x1xf32> to vector<32x128xf32>
      %31 = arith.subf %18, %30 : vector<32x128xf32>
      %cst_20 = arith.constant 9.99999996E-13 : f32
      %32 = vector.broadcast %cst_20 : f32 to vector<32x1xf32>
      %33 = arith.addf %29, %32 : vector<32x1xf32>
      %34 = math.rsqrt %33 : vector<32x1xf32>
      %35 = vector.broadcast %34 : vector<32x1xf32> to vector<32x128xf32>
      %36 = arith.mulf %31, %35 : vector<32x128xf32>
      %c0_21 = arith.constant 0 : index
      %c0_22 = arith.constant 0 : index
      %37 = vector.load %arg6[%c0_21, %c0_22] : memref<1x128xf32, #tpu.memory_space<vmem>>, vector<1x128xf32>
      %38 = vector.broadcast %37 : vector<1x128xf32> to vector<32x128xf32>
      %39 = arith.mulf %36, %38 : vector<32x128xf32>
      %c0_23 = arith.constant 0 : index
      %c0_24 = arith.constant 0 : index
      %40 = vector.load %arg7[%c0_23, %c0_24] : memref<1x128xf32, #tpu.memory_space<vmem>>, vector<1x128xf32>
      %41 = vector.broadcast %40 : vector<1x128xf32> to vector<32x128xf32>
      %42 = arith.addf %39, %41 : vector<32x128xf32>
      %43 = arith.truncf %42 : vector<32x128xf32> to vector<32x128xbf16>
      %c0_25 = arith.constant 0 : index
      %c0_26 = arith.constant 0 : index
      %44 = vector.load %arg8[%c0_25, %c0_26] : memref<32x128xbf16, #tpu.memory_space<vmem>>, vector<32x128xbf16>
      tpu.vector_store %arg8[%c0_25, %c0_26], %43 {strides = array<i32>} : memref<32x128xbf16, #tpu.memory_space<vmem>>, vector<32x128xbf16>,
    } else {
    }
    return
  }
  func.func @transform_0(%arg0: i32, %arg1: i32) -> (i32, i32) {
    %c0_i32 = arith.constant 0 : i32
    return %arg0, %arg1 : i32, i32
  }
  func.func @transform_1(%arg0: i32, %arg1: i32) -> (i32, i32) {
    %c0_i32 = arith.constant 0 : i32
    %c0_i32_0 = arith.constant 0 : i32
    return %arg1, %c0_i32 : i32, i32
  }
  func.func @transform_2(%arg0: i32, %arg1: i32) -> (i32, i32) {
    %c0_i32 = arith.constant 0 : i32
    %c0_i32_0 = arith.constant 0 : i32
    %c0_i32_1 = arith.constant 0 : i32
    return %c0_i32, %c0_i32_0 : i32, i32
  }
  func.func @transform_3(%arg0: i32, %arg1: i32) -> (i32, i32) {
    %c0_i32 = arith.constant 0 : i32
    %c0_i32_0 = arith.constant 0 : i32
    return %arg0, %c0_i32 : i32, i32
  }
  func.func @transform_4(%arg0: i32, %arg1: i32) -> (i32, i32) {
    %c0_i32 = arith.constant 0 : i32
    %c0_i32_0 = arith.constant 0 : i32
    %c0_i32_1 = arith.constant 0 : i32
    return %c0_i32, %c0_i32_0 : i32, i32
  }
  func.func @transform_5(%arg0: i32, %arg1: i32) -> (i32, i32) {
    %c0_i32 = arith.constant 0 : i32
    %c0_i32_0 = arith.constant 0 : i32
    %c0_i32_1 = arith.constant 0 : i32
    return %c0_i32, %c0_i32_0 : i32, i32
  }
  func.func @transform_6(%arg0: i32, %arg1: i32) -> (i32, i32) {
    %c0_i32 = arith.constant 0 : i32
    %c0_i32_0 = arith.constant 0 : i32
    return %arg0, %c0_i32 : i32, i32
  }
}

module attributes {stable_mosaic.version = 11 : i64} {
  func.func @_linear_kernel(%arg0: i32, %arg1: i32, %arg2: i32, %arg3: memref<32x128xbf16, #tpu.memory_space<vmem>>, %arg4: memref<128x256xbf16, #tpu.memory_space<vmem>>, %arg5: memref<1x256xf32, #tpu.memory_space<vmem>>, %arg6: memref<32x256xbf16, #tpu.memory_space<vmem>>, %arg7: memref<32x256xf32, #tpu.memory_space<vmem>>) attributes {dimension_semantics = [#tpu.dimension_semantics<parallel>, #tpu.dimension_semantics<parallel>, #tpu.dimension_semantics<arbitrary>], iteration_bounds = array<i64: 1, 1, 1>, scalar_prefetch = 0 : i64, scratch_operands = 1 : i64, tpu.core_type = #tpu.core_type<tc>, window_params = [{transform_indices = @transform_0, window_bounds = array<i64: 32, 128>}, {transform_indices = @transform_1, window_bounds = array<i64: 128, 256>}, {transform_indices = @transform_2, window_bounds = array<i64: 1, 256>}, {transform_indices = @transform_3, window_bounds = array<i64: 32, 256>}]} {
    %c0_i32 = arith.constant 0 : i32
    %0 = arith.cmpi eq, %arg2, %c0_i32 : i32
    %1 = arith.extui %0 : i1 to i32
    %c0_i32_0 = arith.constant 0 : i32
    %2 = arith.cmpi ne, %1, %c0_i32_0 : i32
    scf.if %2 {
      %cst_10 = arith.constant 0.000000e+00 : f32
      %12 = vector.broadcast %cst_10 : f32 to vector<32x256xf32>
      %c0_11 = arith.constant 0 : index
      %c0_12 = arith.constant 0 : index
      %13 = vector.load %arg7[%c0_11, %c0_12] : memref<32x256xf32, #tpu.memory_space<vmem>>, vector<32x256xf32>
      tpu.vector_store %arg7[%c0_11, %c0_12], %12 {strides = array<i32>} : memref<32x256xf32, #tpu.memory_space<vmem>>, vector<32x256xf32>,
    } else {
    }
    %c0 = arith.constant 0 : index
    %c0_1 = arith.constant 0 : index
    %3 = vector.load %arg7[%c0, %c0_1] : memref<32x256xf32, #tpu.memory_space<vmem>>, vector<32x256xf32>
    %c0_2 = arith.constant 0 : index
    %c0_3 = arith.constant 0 : index
    %4 = vector.load %arg3[%c0_2, %c0_3] : memref<32x128xbf16, #tpu.memory_space<vmem>>, vector<32x128xbf16>
    %c0_4 = arith.constant 0 : index
    %c0_5 = arith.constant 0 : index
    %5 = vector.load %arg4[%c0_4, %c0_5] : memref<128x256xbf16, #tpu.memory_space<vmem>>, vector<128x256xbf16>
    %cst = arith.constant dense<0.000000e+00> : vector<32x256xf32>
    %6 = tpu.matmul %4, %5, %cst {dimension_numbers = #tpu.dot_dimension_numbers<[1], [0], [0], [1], [0, 0, 1, 1], [], []>} : vector<32x128xbf16>, vector<128x256xbf16>, vector<32x256xf32> -> vector<32x256xf32>
    %7 = arith.addf %3, %6 : vector<32x256xf32>
    %c0_6 = arith.constant 0 : index
    %c0_7 = arith.constant 0 : index
    %8 = vector.load %arg7[%c0_6, %c0_7] : memref<32x256xf32, #tpu.memory_space<vmem>>, vector<32x256xf32>
    tpu.vector_store %arg7[%c0_6, %c0_7], %7 {strides = array<i32>} : memref<32x256xf32, #tpu.memory_space<vmem>>, vector<32x256xf32>,
    %c0_i32_8 = arith.constant 0 : i32
    %9 = arith.cmpi eq, %arg2, %c0_i32_8 : i32
    %10 = arith.extui %9 : i1 to i32
    %c0_i32_9 = arith.constant 0 : i32
    %11 = arith.cmpi ne, %10, %c0_i32_9 : i32
    scf.if %11 {
      %c0_10 = arith.constant 0 : index
      %c0_11 = arith.constant 0 : index
      %12 = vector.load %arg7[%c0_10, %c0_11] : memref<32x256xf32, #tpu.memory_space<vmem>>, vector<32x256xf32>
      %c0_12 = arith.constant 0 : index
      %c0_13 = arith.constant 0 : index
      %13 = vector.load %arg5[%c0_12, %c0_13] : memref<1x256xf32, #tpu.memory_space<vmem>>, vector<1x256xf32>
      %14 = vector.broadcast %13 : vector<1x256xf32> to vector<32x256xf32>
      %15 = arith.addf %12, %14 : vector<32x256xf32>
      %16 = arith.mulf %15, %15 : vector<32x256xf32>
      %17 = arith.mulf %15, %16 : vector<32x256xf32>
      %cst_14 = arith.constant 4.471500e-02 : f32
      %18 = vector.broadcast %cst_14 : f32 to vector<32x256xf32>
      %19 = arith.mulf %18, %17 : vector<32x256xf32>
      %20 = arith.addf %15, %19 : vector<32x256xf32>
      %cst_15 = arith.constant 0.797884583 : f32
      %21 = vector.broadcast %cst_15 : f32 to vector<32x256xf32>
      %22 = arith.mulf %21, %20 : vector<32x256xf32>
      %23 = math.tanh %22 : vector<32x256xf32>
      %cst_16 = arith.constant 1.000000e+00 : f32
      %24 = vector.broadcast %cst_16 : f32 to vector<32x256xf32>
      %25 = arith.addf %24, %23 : vector<32x256xf32>
      %cst_17 = arith.constant 5.000000e-01 : f32
      %26 = vector.broadcast %cst_17 : f32 to vector<32x256xf32>
      %27 = arith.mulf %26, %25 : vector<32x256xf32>
      %28 = arith.mulf %15, %27 : vector<32x256xf32>
      %29 = arith.truncf %28 : vector<32x256xf32> to vector<32x256xbf16>
      %c0_18 = arith.constant 0 : index
      %c0_19 = arith.constant 0 : index
      %30 = vector.load %arg6[%c0_18, %c0_19] : memref<32x256xbf16, #tpu.memory_space<vmem>>, vector<32x256xbf16>
      tpu.vector_store %arg6[%c0_18, %c0_19], %29 {strides = array<i32>} : memref<32x256xbf16, #tpu.memory_space<vmem>>, vector<32x256xbf16>,
    } else {
    }
    return
  }
  func.func @transform_0(%arg0: i32, %arg1: i32, %arg2: i32) -> (i32, i32) {
    %c0_i32 = arith.constant 0 : i32
    return %arg0, %arg2 : i32, i32
  }
  func.func @transform_1(%arg0: i32, %arg1: i32, %arg2: i32) -> (i32, i32) {
    %c0_i32 = arith.constant 0 : i32
    return %arg2, %arg1 : i32, i32
  }
  func.func @transform_2(%arg0: i32, %arg1: i32, %arg2: i32) -> (i32, i32) {
    %c0_i32 = arith.constant 0 : i32
    %c0_i32_0 = arith.constant 0 : i32
    return %c0_i32, %arg1 : i32, i32
  }
  func.func @transform_3(%arg0: i32, %arg1: i32, %arg2: i32) -> (i32, i32) {
    %c0_i32 = arith.constant 0 : i32
    return %arg0, %arg1 : i32, i32
  }
}

module attributes {stable_mosaic.version = 11 : i64} {
  func.func @_linear_kernel(%arg0: i32, %arg1: i32, %arg2: i32, %arg3: memref<32x128xbf16, #tpu.memory_space<vmem>>, %arg4: memref<128x128xbf16, #tpu.memory_space<vmem>>, %arg5: memref<1x128xf32, #tpu.memory_space<vmem>>, %arg6: memref<32x128xf32, #tpu.memory_space<vmem>>, %arg7: memref<32x128xf32, #tpu.memory_space<vmem>>) attributes {dimension_semantics = [#tpu.dimension_semantics<parallel>, #tpu.dimension_semantics<parallel>, #tpu.dimension_semantics<arbitrary>], iteration_bounds = array<i64: 1, 1, 1>, scalar_prefetch = 0 : i64, scratch_operands = 1 : i64, tpu.core_type = #tpu.core_type<tc>, window_params = [{transform_indices = @transform_0, window_bounds = array<i64: 32, 128>}, {transform_indices = @transform_1, window_bounds = array<i64: 128, 128>}, {transform_indices = @transform_2, window_bounds = array<i64: 1, 128>}, {transform_indices = @transform_3, window_bounds = array<i64: 32, 128>}]} {
    %c0_i32 = arith.constant 0 : i32
    %0 = arith.cmpi eq, %arg2, %c0_i32 : i32
    %1 = arith.extui %0 : i1 to i32
    %c0_i32_0 = arith.constant 0 : i32
    %2 = arith.cmpi ne, %1, %c0_i32_0 : i32
    scf.if %2 {
      %cst_10 = arith.constant 0.000000e+00 : f32
      %12 = vector.broadcast %cst_10 : f32 to vector<32x128xf32>
      %c0_11 = arith.constant 0 : index
      %c0_12 = arith.constant 0 : index
      %13 = vector.load %arg7[%c0_11, %c0_12] : memref<32x128xf32, #tpu.memory_space<vmem>>, vector<32x128xf32>
      tpu.vector_store %arg7[%c0_11, %c0_12], %12 {strides = array<i32>} : memref<32x128xf32, #tpu.memory_space<vmem>>, vector<32x128xf32>,
    } else {
    }
    %c0 = arith.constant 0 : index
    %c0_1 = arith.constant 0 : index
    %3 = vector.load %arg7[%c0, %c0_1] : memref<32x128xf32, #tpu.memory_space<vmem>>, vector<32x128xf32>
    %c0_2 = arith.constant 0 : index
    %c0_3 = arith.constant 0 : index
    %4 = vector.load %arg3[%c0_2, %c0_3] : memref<32x128xbf16, #tpu.memory_space<vmem>>, vector<32x128xbf16>
    %c0_4 = arith.constant 0 : index
    %c0_5 = arith.constant 0 : index
    %5 = vector.load %arg4[%c0_4, %c0_5] : memref<128x128xbf16, #tpu.memory_space<vmem>>, vector<128x128xbf16>
    %cst = arith.constant dense<0.000000e+00> : vector<32x128xf32>
    %6 = tpu.matmul %4, %5, %cst {dimension_numbers = #tpu.dot_dimension_numbers<[1], [0], [0], [1], [0, 0, 1, 1], [], []>} : vector<32x128xbf16>, vector<128x128xbf16>, vector<32x128xf32> -> vector<32x128xf32>
    %7 = arith.addf %3, %6 : vector<32x128xf32>
    %c0_6 = arith.constant 0 : index
    %c0_7 = arith.constant 0 : index
    %8 = vector.load %arg7[%c0_6, %c0_7] : memref<32x128xf32, #tpu.memory_space<vmem>>, vector<32x128xf32>
    tpu.vector_store %arg7[%c0_6, %c0_7], %7 {strides = array<i32>} : memref<32x128xf32, #tpu.memory_space<vmem>>, vector<32x128xf32>,
    %c0_i32_8 = arith.constant 0 : i32
    %9 = arith.cmpi eq, %arg2, %c0_i32_8 : i32
    %10 = arith.extui %9 : i1 to i32
    %c0_i32_9 = arith.constant 0 : i32
    %11 = arith.cmpi ne, %10, %c0_i32_9 : i32
    scf.if %11 {
      %c0_10 = arith.constant 0 : index
      %c0_11 = arith.constant 0 : index
      %12 = vector.load %arg7[%c0_10, %c0_11] : memref<32x128xf32, #tpu.memory_space<vmem>>, vector<32x128xf32>
      %c0_12 = arith.constant 0 : index
      %c0_13 = arith.constant 0 : index
      %13 = vector.load %arg5[%c0_12, %c0_13] : memref<1x128xf32, #tpu.memory_space<vmem>>, vector<1x128xf32>
      %14 = vector.broadcast %13 : vector<1x128xf32> to vector<32x128xf32>
      %15 = arith.addf %12, %14 : vector<32x128xf32>
      %c0_14 = arith.constant 0 : index
      %c0_15 = arith.constant 0 : index
      %16 = vector.load %arg6[%c0_14, %c0_15] : memref<32x128xf32, #tpu.memory_space<vmem>>, vector<32x128xf32>
      tpu.vector_store %arg6[%c0_14, %c0_15], %15 {strides = array<i32>} : memref<32x128xf32, #tpu.memory_space<vmem>>, vector<32x128xf32>,
    } else {
    }
    return
  }
  func.func @transform_0(%arg0: i32, %arg1: i32, %arg2: i32) -> (i32, i32) {
    %c0_i32 = arith.constant 0 : i32
    return %arg0, %arg2 : i32, i32
  }
  func.func @transform_1(%arg0: i32, %arg1: i32, %arg2: i32) -> (i32, i32) {
    %c0_i32 = arith.constant 0 : i32
    return %arg2, %arg1 : i32, i32
  }
  func.func @transform_2(%arg0: i32, %arg1: i32, %arg2: i32) -> (i32, i32) {
    %c0_i32 = arith.constant 0 : i32
    %c0_i32_0 = arith.constant 0 : i32
    return %c0_i32, %arg1 : i32, i32
  }
  func.func @transform_3(%arg0: i32, %arg1: i32, %arg2: i32) -> (i32, i32) {
    %c0_i32 = arith.constant 0 : i32
    return %arg0, %arg1 : i32, i32
  }
}

module attributes {stable_mosaic.version = 11 : i64} {
  func.func @_linear_res_ln_kernel(%arg0: i32, %arg1: i32, %arg2: memref<32x256xbf16, #tpu.memory_space<vmem>>, %arg3: memref<256x128xbf16, #tpu.memory_space<vmem>>, %arg4: memref<1x128xf32, #tpu.memory_space<vmem>>, %arg5: memref<32x128xbf16, #tpu.memory_space<vmem>>, %arg6: memref<1x128xf32, #tpu.memory_space<vmem>>, %arg7: memref<1x128xf32, #tpu.memory_space<vmem>>, %arg8: memref<32x128xbf16, #tpu.memory_space<vmem>>, %arg9: memref<32x128xf32, #tpu.memory_space<vmem>>) attributes {dimension_semantics = [#tpu.dimension_semantics<parallel>, #tpu.dimension_semantics<arbitrary>], iteration_bounds = array<i64: 1, 1>, scalar_prefetch = 0 : i64, scratch_operands = 1 : i64, tpu.core_type = #tpu.core_type<tc>, window_params = [{transform_indices = @transform_0, window_bounds = array<i64: 32, 256>}, {transform_indices = @transform_1, window_bounds = array<i64: 256, 128>}, {pipeline_mode = #tpu.pipeline_mode<synchronous>, transform_indices = @transform_2, window_bounds = array<i64: 1, 128>}, {transform_indices = @transform_3, window_bounds = array<i64: 32, 128>}, {pipeline_mode = #tpu.pipeline_mode<synchronous>, transform_indices = @transform_4, window_bounds = array<i64: 1, 128>}, {pipeline_mode = #tpu.pipeline_mode<synchronous>, transform_indices = @transform_5, window_bounds = array<i64: 1, 128>}, {transform_indices = @transform_6, window_bounds = array<i64: 32, 128>}]} {
    %c0_i32 = arith.constant 0 : i32
    %0 = arith.cmpi eq, %arg1, %c0_i32 : i32
    %1 = arith.extui %0 : i1 to i32
    %c0_i32_0 = arith.constant 0 : i32
    %2 = arith.cmpi ne, %1, %c0_i32_0 : i32
    scf.if %2 {
      %cst_10 = arith.constant 0.000000e+00 : f32
      %12 = vector.broadcast %cst_10 : f32 to vector<32x128xf32>
      %c0_11 = arith.constant 0 : index
      %c0_12 = arith.constant 0 : index
      %13 = vector.load %arg9[%c0_11, %c0_12] : memref<32x128xf32, #tpu.memory_space<vmem>>, vector<32x128xf32>
      tpu.vector_store %arg9[%c0_11, %c0_12], %12 {strides = array<i32>} : memref<32x128xf32, #tpu.memory_space<vmem>>, vector<32x128xf32>,
    } else {
    }
    %c0 = arith.constant 0 : index
    %c0_1 = arith.constant 0 : index
    %3 = vector.load %arg9[%c0, %c0_1] : memref<32x128xf32, #tpu.memory_space<vmem>>, vector<32x128xf32>
    %c0_2 = arith.constant 0 : index
    %c0_3 = arith.constant 0 : index
    %4 = vector.load %arg2[%c0_2, %c0_3] : memref<32x256xbf16, #tpu.memory_space<vmem>>, vector<32x256xbf16>
    %c0_4 = arith.constant 0 : index
    %c0_5 = arith.constant 0 : index
    %5 = vector.load %arg3[%c0_4, %c0_5] : memref<256x128xbf16, #tpu.memory_space<vmem>>, vector<256x128xbf16>
    %cst = arith.constant dense<0.000000e+00> : vector<32x128xf32>
    %6 = tpu.matmul %4, %5, %cst {dimension_numbers = #tpu.dot_dimension_numbers<[1], [0], [0], [1], [0, 0, 1, 1], [], []>} : vector<32x256xbf16>, vector<256x128xbf16>, vector<32x128xf32> -> vector<32x128xf32>
    %7 = arith.addf %3, %6 : vector<32x128xf32>
    %c0_6 = arith.constant 0 : index
    %c0_7 = arith.constant 0 : index
    %8 = vector.load %arg9[%c0_6, %c0_7] : memref<32x128xf32, #tpu.memory_space<vmem>>, vector<32x128xf32>
    tpu.vector_store %arg9[%c0_6, %c0_7], %7 {strides = array<i32>} : memref<32x128xf32, #tpu.memory_space<vmem>>, vector<32x128xf32>,
    %c0_i32_8 = arith.constant 0 : i32
    %9 = arith.cmpi eq, %arg1, %c0_i32_8 : i32
    %10 = arith.extui %9 : i1 to i32
    %c0_i32_9 = arith.constant 0 : i32
    %11 = arith.cmpi ne, %10, %c0_i32_9 : i32
    scf.if %11 {
      %c0_10 = arith.constant 0 : index
      %c0_11 = arith.constant 0 : index
      %12 = vector.load %arg9[%c0_10, %c0_11] : memref<32x128xf32, #tpu.memory_space<vmem>>, vector<32x128xf32>
      %c0_12 = arith.constant 0 : index
      %c0_13 = arith.constant 0 : index
      %13 = vector.load %arg4[%c0_12, %c0_13] : memref<1x128xf32, #tpu.memory_space<vmem>>, vector<1x128xf32>
      %14 = vector.broadcast %13 : vector<1x128xf32> to vector<32x128xf32>
      %15 = arith.addf %12, %14 : vector<32x128xf32>
      %c0_14 = arith.constant 0 : index
      %c0_15 = arith.constant 0 : index
      %16 = vector.load %arg5[%c0_14, %c0_15] : memref<32x128xbf16, #tpu.memory_space<vmem>>, vector<32x128xbf16>
      %17 = arith.extf %16 : vector<32x128xbf16> to vector<32x128xf32>
      %18 = arith.addf %15, %17 : vector<32x128xf32>
      %cst_16 = arith.constant dense<0.000000e+00> : vector<32xf32>
      %19 = vector.multi_reduction <add>, %18, %cst_16 [1] : vector<32x128xf32> to vector<32xf32>
      %20 = vector.shape_cast %19 : vector<32xf32> to vector<32x1xf32>
      %cst_17 = arith.constant 1.280000e+02 : f32
      %21 = vector.broadcast %cst_17 : f32 to vector<32x1xf32>
      %22 = arith.divf %20, %21 : vector<32x1xf32>
      %23 = vector.broadcast %22 : vector<32x1xf32> to vector<32x128xf32>
      %24 = arith.subf %18, %23 : vector<32x128xf32>
      %25 = arith.mulf %24, %24 : vector<32x128xf32>
      %cst_18 = arith.constant dense<0.000000e+00> : vector<32xf32>
      %26 = vector.multi_reduction <add>, %25, %cst_18 [1] : vector<32x128xf32> to vector<32xf32>
      %27 = vector.shape_cast %26 : vector<32xf32> to vector<32x1xf32>
      %cst_19 = arith.constant 1.280000e+02 : f32
      %28 = vector.broadcast %cst_19 : f32 to vector<32x1xf32>
      %29 = arith.divf %27, %28 : vector<32x1xf32>
      %30 = vector.broadcast %22 : vector<32x1xf32> to vector<32x128xf32>
      %31 = arith.subf %18, %30 : vector<32x128xf32>
      %cst_20 = arith.constant 9.99999996E-13 : f32
      %32 = vector.broadcast %cst_20 : f32 to vector<32x1xf32>
      %33 = arith.addf %29, %32 : vector<32x1xf32>
      %34 = math.rsqrt %33 : vector<32x1xf32>
      %35 = vector.broadcast %34 : vector<32x1xf32> to vector<32x128xf32>
      %36 = arith.mulf %31, %35 : vector<32x128xf32>
      %c0_21 = arith.constant 0 : index
      %c0_22 = arith.constant 0 : index
      %37 = vector.load %arg6[%c0_21, %c0_22] : memref<1x128xf32, #tpu.memory_space<vmem>>, vector<1x128xf32>
      %38 = vector.broadcast %37 : vector<1x128xf32> to vector<32x128xf32>
      %39 = arith.mulf %36, %38 : vector<32x128xf32>
      %c0_23 = arith.constant 0 : index
      %c0_24 = arith.constant 0 : index
      %40 = vector.load %arg7[%c0_23, %c0_24] : memref<1x128xf32, #tpu.memory_space<vmem>>, vector<1x128xf32>
      %41 = vector.broadcast %40 : vector<1x128xf32> to vector<32x128xf32>
      %42 = arith.addf %39, %41 : vector<32x128xf32>
      %43 = arith.truncf %42 : vector<32x128xf32> to vector<32x128xbf16>
      %c0_25 = arith.constant 0 : index
      %c0_26 = arith.constant 0 : index
      %44 = vector.load %arg8[%c0_25, %c0_26] : memref<32x128xbf16, #tpu.memory_space<vmem>>, vector<32x128xbf16>
      tpu.vector_store %arg8[%c0_25, %c0_26], %43 {strides = array<i32>} : memref<32x128xbf16, #tpu.memory_space<vmem>>, vector<32x128xbf16>,
    } else {
    }
    return
  }
  func.func @transform_0(%arg0: i32, %arg1: i32) -> (i32, i32) {
    %c0_i32 = arith.constant 0 : i32
    return %arg0, %arg1 : i32, i32
  }
  func.func @transform_1(%arg0: i32, %arg1: i32) -> (i32, i32) {
    %c0_i32 = arith.constant 0 : i32
    %c0_i32_0 = arith.constant 0 : i32
    return %arg1, %c0_i32 : i32, i32
  }
  func.func @transform_2(%arg0: i32, %arg1: i32) -> (i32, i32) {
    %c0_i32 = arith.constant 0 : i32
    %c0_i32_0 = arith.constant 0 : i32
    %c0_i32_1 = arith.constant 0 : i32
    return %c0_i32, %c0_i32_0 : i32, i32
  }
  func.func @transform_3(%arg0: i32, %arg1: i32) -> (i32, i32) {
    %c0_i32 = arith.constant 0 : i32
    %c0_i32_0 = arith.constant 0 : i32
    return %arg0, %c0_i32 : i32, i32
  }
  func.func @transform_4(%arg0: i32, %arg1: i32) -> (i32, i32) {
    %c0_i32 = arith.constant 0 : i32
    %c0_i32_0 = arith.constant 0 : i32
    %c0_i32_1 = arith.constant 0 : i32
    return %c0_i32, %c0_i32_0 : i32, i32
  }
  func.func @transform_5(%arg0: i32, %arg1: i32) -> (i32, i32) {
    %c0_i32 = arith.constant 0 : i32
    %c0_i32_0 = arith.constant 0 : i32
    %c0_i32_1 = arith.constant 0 : i32
    return %c0_i32, %c0_i32_0 : i32, i32
  }
  func.func @transform_6(%arg0: i32, %arg1: i32) -> (i32, i32) {
    %c0_i32 = arith.constant 0 : i32
    %c0_i32_0 = arith.constant 0 : i32
    return %arg0, %c0_i32 : i32, i32
  }
}

</mosaic_0001>

<bundles_post_ra>
// kernel: _lambda_.12
= control target key start
LH: loop header
LB: loop body
LE: loop exit
PB: predicated region body
PF: predicated region fallthrough
CT: control target
= control target key end

     0   :  { %s189_s0 = inlined_call_operand.vmem [shape: bf16[32,128], index: 0, kind: input, shape index: {}]   ;;  %s190_s1 = inlined_call_operand.vmem [shape: f32[1,128], index: 1, kind: input, shape index: {}]   ;;  %s191_s2 = inlined_call_operand.vmem [shape: f32[1,128], index: 2, kind: input, shape index: {}]   ;;  %s192_s3 = inlined_call_operand.vmem [shape: bf16[32,128], index: 3, kind: output, shape index: {}]  }
   0x1   :  { %v124_v0 = vld [vmem:[%s189_s0] sm:$0xff]   ;;  %v141_v1 = vld [vmem:[%s189_s0 + $0x8] sm:$0xff]  }
   0x2   :  { %v125_v2 = vunpack.c.l.bf16 %v124_v0  ;;  %v129_v3 = vunpack.c.l.bf16 %v141_v1  ;;  %v126_v4 = vunpack.c.h.bf16 %v124_v0  ;;  %v130_v5 = vunpack.c.h.bf16 %v141_v1  ;;  %v113_v36 = vld [vmem:[%s190_s1] ss:$0 sm:$0xff] }
   0x3   :  { %v114_v41 = vld [vmem:[%s191_s2] ss:$0 sm:$0xff] }
   0x4   :  { %22 = vadd.xlane.f32.xlu0 %v125_v2  ;;  %26 = vadd.xlane.f32.xlu1 %v129_v3 }
   0x8   :  { %24 = vadd.xlane.f32.xlu0 %v126_v4  ;;  %28 = vadd.xlane.f32.xlu1 %v130_v5 }
  0x91   :  { %v23_v6 = vpop.xlane.xlu0 %22  ;;  %v27_v7 = vpop.xlane.xlu1 %26 }
  0x92   :  { %v31_v8 = vmul.f32 0.0078125, %v23_v6  ;;  %v33_v9 = vmul.f32 0.0078125, %v27_v7 }
  0x94   :  { %v35_v10 = vsub.f32 %v125_v2, %v31_v8  ;;  %v37_v11 = vsub.f32 %v129_v3, %v33_v9 }
  0x95   :  { %v25_v12 = vpop.xlane.xlu0 %24  ;;  %v29_v13 = vpop.xlane.xlu1 %28 }
  0x96   :  { %v32_v14 = vmul.f32 0.0078125, %v25_v12  ;;  %v39_v15 = vmul.f32 %v35_v10, %v35_v10  ;;  %v34_v16 = vmul.f32 0.0078125, %v29_v13  ;;  %v41_v19 = vmul.f32 %v37_v11, %v37_v11 }
  0x98   :  { %v36_v17 = vsub.f32 %v126_v4, %v32_v14  ;;  %43 = vadd.xlane.f32.xlu0 %v39_v15  ;;  %v38_v18 = vsub.f32 %v130_v5, %v34_v16 }
  0x9a   :  { %v40_v20 = vmul.f32 %v36_v17, %v36_v17  ;;  %v42_v21 = vmul.f32 %v38_v18, %v38_v18 }
  0x9c   :  { %47 = vadd.xlane.f32.xlu0 %v41_v19  ;;  %45 = vadd.xlane.f32.xlu1 %v40_v20 }
  0xa0   :  { %49 = vadd.xlane.f32.xlu1 %v42_v21 }
 0x125   :  { %v44_v22 = vpop.xlane.xlu0 %43 }
 0x126   :  { %v51_v23 = vmul.f32 0.0078125, %v44_v22 }
 0x128   :  { %v55_v24 = vadd.f32 1e-12, %v51_v23 }
 0x129   :  { %v46_v25 = vpop.xlane.xlu1 %45  ;;  %v48_v26 = vpop.xlane.xlu0 %47 }
 0x12a   :  { %143 = vrsqrt.f32 %v55_v24  ;;  %v52_v27 = vmul.f32 0.0078125, %v46_v25  ;;  %v53_v28 = vmul.f32 0.0078125, %v48_v26 }
 0x12c   :  { %v56_v29 = vadd.f32 1e-12, %v52_v27  ;;  %v57_v30 = vadd.f32 1e-12, %v53_v28 }
 0x12d   :  { %v50_v31 = vpop.xlane.xlu1 %49 }
 0x12e   :  { %145 = vrsqrt.f32 %v56_v29  ;;  %v54_v32 = vmul.f32 0.0078125, %v50_v31 }
 0x12f   :  { %147 = vrsqrt.f32 %v57_v30 }
 0x130   :  { %v58_v33 = vadd.f32 1e-12, %v54_v32 }
 0x132   :  { %149 = vrsqrt.f32 %v58_v33 }
 0x134   :  { %v144_v34 = vpop.eup %143 }
 0x135   :  { %v63_v35 = vmul.f32 %v144_v34, %v35_v10 }
 0x137   :  { %v74_v39 = vmul.f32 %v113_v36, %v63_v35 }
 0x138   :  { %v146_v37 = vpop.eup %145 }
 0x139   :  { %v148_v38 = vpop.eup %147  ;;  %v64_v40 = vmul.f32 %v146_v37, %v36_v17  ;;  %v85_v45 = vadd.f32 %v114_v41, %v74_v39 }
 0x13a   :  { %v65_v42 = vmul.f32 %v148_v38, %v37_v11 }
 0x13b   :  { %v75_v43 = vmul.f32 %v113_v36, %v64_v40 }
 0x13c   :  { %v150_v44 = vpop.eup %149  ;;  %v76_v47 = vmul.f32 %v113_v36, %v65_v42 }
 0x13d   :  { %v86_v46 = vadd.f32 %v114_v41, %v75_v43  ;;  %v66_v48 = vmul.f32 %v150_v44, %v38_v18 }
 0x13e   :  { %v87_v51 = vadd.f32 %v114_v41, %v76_v47 }
 0x13f   :  { %v134_v49 = vpack.c.bf16 %v86_v46, %v85_v45  ;;  %v77_v50 = vmul.f32 %v113_v36, %v66_v48 }
 0x141   :  { %135 = vst [vmem:[%s192_s3] sm:$0xff] %v134_v49   ;;  %v88_v52 = vadd.f32 %v114_v41, %v77_v50 }
 0x143   :  { %v139_v53 = vpack.c.bf16 %v88_v52, %v87_v51 }
 0x145   :  { %142 = vst [vmem:[%s192_s3 + $0x8] sm:$0xff] %v139_v53  }

// kernel: _lambda_.15
= control target key start
LH: loop header
LB: loop body
LE: loop exit
PB: predicated region body
PF: predicated region fallthrough
CT: control target
= control target key end

     0   :  { %s469_s1 = inlined_call_operand.vmem [shape: bf16[128,128], index: 1, kind: input, shape index: {}]   ;;  %s470_s0 = inlined_call_operand.vmem [shape: bf16[32,128], index: 0, kind: input, shape index: {}]   ;;  %s471_s3 = inlined_call_operand.vmem [shape: bf16[32,128], index: 3, kind: input, shape index: {}]   ;;  %s472_s2 = inlined_call_operand.vmem [shape: f32[1,128], index: 2, kind: input, shape index: {}]   ;;  %s473_s4 = inlined_call_operand.vmem [shape: f32[1,128], index: 4, kind: input, shape index: {}]   ;;  %s474_s5 = inlined_call_operand.vmem [shape: f32[1,128], index: 5, kind: input, shape index: {}]   ;;  %s475_s6 = inlined_call_operand.vmem [shape: bf16[32,128], index: 6, kind: output, shape index: {}]  }
   0x1   :  { %v365_v0 = vld [vmem:[%s469_s1] sm:$0xff]   ;;  %v366_v1 = vld [vmem:[%s469_s1 + $0x8] sm:$0xff]   ;;  %v367_v2 = vld [vmem:[%s469_s1 + $0x10] sm:$0xff]  }
   0x2   :  { %345 = vmatprep.subr.bf16.mxu0 %v365_v0  ;;  %v368_v3 = vld [vmem:[%s469_s1 + $0x18] sm:$0xff]   ;;  %v373_v4 = vld [vmem:[%s470_s0] sm:$0xff]   ;;  %v370_v6 = vld [vmem:[%s469_s1 + $0x28] sm:$0xff]  }
   0x3   :  { %346 = vmatpush3.bf16.msra.mxu0 %v365_v0  ;;  %361 = vmatprep.mubr.bf16.mxu0 %v373_v4  ;;  %v369_v5 = vld [vmem:[%s469_s1 + $0x20] sm:$0xff]   ;;  %v371_v7 = vld [vmem:[%s469_s1 + $0x30] sm:$0xff]   ;;  %v372_v8 = vld [vmem:[%s469_s1 + $0x38] sm:$0xff]  }
   0x4   :  { %347 = vmatprep.subr.bf16.mxu0 %v366_v1  ;;  %v374_v9 = vld [vmem:[%s470_s0 + $0x8] sm:$0xff]   ;;  %v316_v11 = vld [vmem:[%s471_s3] sm:$0xff]  }
   0x5   :  { %v333_v10 = vld [vmem:[%s471_s3 + $0x8] sm:$0xff]   ;;  %v304_v12 = vld [vmem:[%s472_s2] ss:$0 sm:$0xff]  ;;  %v317_v15 = vunpack.c.l.bf16 %v316_v11  ;;  %v318_v26 = vunpack.c.h.bf16 %v316_v11 }
   0x6   :  { %v321_v13 = vunpack.c.l.bf16 %v333_v10  ;;  %v322_v23 = vunpack.c.h.bf16 %v333_v10  ;;  %v305_v59 = vld [vmem:[%s473_s4] ss:$0 sm:$0xff] }
   0x7   :  { %348 = vmatpush3.bf16.msra.mxu0 %v366_v1  ;;  %v306_v0 = vld [vmem:[%s474_s5] ss:$0 sm:$0xff] }
   0x8   :  { %349 = vmatprep.subr.bf16.mxu0 %v367_v2 }
   0xb   :  { %350 = vmatpush3.bf16.msra.mxu0 %v367_v2 }
   0xc   :  { %351 = vmatprep.subr.bf16.mxu0 %v368_v3 }
   0xf   :  { %352 = vmatpush3.bf16.msra.mxu0 %v368_v3 }
  0x10   :  { %353 = vmatprep.subr.bf16.mxu0 %v369_v5 }
  0x13   :  { %354 = vmatpush3.bf16.msra.mxu0 %v369_v5 }
  0x14   :  { %355 = vmatprep.subr.bf16.mxu0 %v370_v6 }
  0x17   :  { %356 = vmatpush3.bf16.msra.mxu0 %v370_v6 }
  0x18   :  { %357 = vmatprep.subr.bf16.mxu0 %v371_v7 }
  0x1b   :  { %358 = vmatpush3.bf16.msra.mxu0 %v371_v7 }
  0x1c   :  { %359 = vmatprep.subr.bf16.mxu0 %v372_v8 }
  0x1f   :  { %360 = vmatpush3.bf16.msra.mxu0 %v372_v8 }
  0x22   :  { %362 = vmatmul.mubr.bf16.vlgmr.msra.gmra.mrb[0].mxu0 %v374_v9 }
  0xf5   :  { %v363_v14 = vpop.f32.mrb[0].mxu0 }
  0xf6   :  { %v189_v16 = vadd.f32 %v363_v14, %v304_v12  ;;  %v150_v17 = vpop.f32.mrb[1].mxu0 }
  0xf7   :  { %v187_v18 = vadd.f32 %v304_v12, %v150_v17  ;;  %v364_v19 = vpop.f32.mrb[2].mxu0 }
  0xf8   :  { %v190_v20 = vadd.f32 %v364_v19, %v304_v12  ;;  %v153_v21 = vpop.f32.mrb[3].mxu0  ;;  %v201_v22 = vadd.f32 %v321_v13, %v189_v16 }
  0xf9   :  { %v188_v24 = vadd.f32 %v304_v12, %v153_v21  ;;  %v199_v25 = vadd.f32 %v317_v15, %v187_v18 }
  0xfa   :  { %207 = vadd.xlane.f32.xlu1 %v201_v22  ;;  %v202_v27 = vadd.f32 %v322_v23, %v190_v20 }
  0xfb   :  { %203 = vadd.xlane.f32.xlu0 %v199_v25  ;;  %v200_v28 = vadd.f32 %v318_v26, %v188_v24 }
  0xfe   :  { %209 = vadd.xlane.f32.xlu1 %v202_v27 }
  0xff   :  { %205 = vadd.xlane.f32.xlu0 %v200_v28 }
 0x187   :  { %v208_v29 = vpop.xlane.xlu1 %207 }
 0x188   :  { %v204_v30 = vpop.xlane.xlu0 %203  ;;  %v214_v31 = vmul.f32 0.0078125, %v208_v29 }
 0x189   :  { %v212_v32 = vmul.f32 0.0078125, %v204_v30 }
 0x18a   :  { %v218_v36 = vsub.f32 %v201_v22, %v214_v31 }
 0x18b   :  { %v216_v33 = vsub.f32 %v199_v25, %v212_v32  ;;  %v210_v34 = vpop.xlane.xlu1 %209 }
 0x18c   :  { %v206_v35 = vpop.xlane.xlu0 %205  ;;  %v215_v37 = vmul.f32 0.0078125, %v210_v34  ;;  %v222_v42 = vmul.f32 %v218_v36, %v218_v36 }
 0x18d   :  { %v213_v38 = vmul.f32 0.0078125, %v206_v35  ;;  %v220_v39 = vmul.f32 %v216_v33, %v216_v33 }
 0x18e   :  { %v219_v41 = vsub.f32 %v202_v27, %v215_v37 }
 0x18f   :  { %v217_v40 = vsub.f32 %v200_v28, %v213_v38  ;;  %224 = vadd.xlane.f32.xlu0 %v220_v39 }
 0x190   :  { %v223_v44 = vmul.f32 %v219_v41, %v219_v41 }
 0x191   :  { %v221_v43 = vmul.f32 %v217_v40, %v217_v40 }
 0x193   :  { %228 = vadd.xlane.f32.xlu0 %v222_v42  ;;  %226 = vadd.xlane.f32.xlu1 %v221_v43 }
 0x197   :  { %230 = vadd.xlane.f32.xlu1 %v223_v44 }
 0x21c   :  { %v225_v45 = vpop.xlane.xlu0 %224 }
 0x21d   :  { %v232_v46 = vmul.f32 0.0078125, %v225_v45 }
 0x21f   :  { %v236_v47 = vadd.f32 1e-12, %v232_v46 }
 0x220   :  { %v227_v48 = vpop.xlane.xlu1 %226  ;;  %v229_v49 = vpop.xlane.xlu0 %228 }
 0x221   :  { %375 = vrsqrt.f32 %v236_v47  ;;  %v233_v50 = vmul.f32 0.0078125, %v227_v48  ;;  %v234_v51 = vmul.f32 0.0078125, %v229_v49 }
 0x223   :  { %v237_v52 = vadd.f32 1e-12, %v233_v50  ;;  %v238_v53 = vadd.f32 1e-12, %v234_v51 }
 0x224   :  { %v231_v54 = vpop.xlane.xlu1 %230 }
 0x225   :  { %377 = vrsqrt.f32 %v237_v52  ;;  %v235_v55 = vmul.f32 0.0078125, %v231_v54 }
 0x226   :  { %379 = vrsqrt.f32 %v238_v53 }
 0x227   :  { %v239_v56 = vadd.f32 1e-12, %v235_v55 }
 0x229   :  { %381 = vrsqrt.f32 %v239_v56 }
 0x22b   :  { %v376_v57 = vpop.eup %375 }
 0x22c   :  { %v244_v58 = vmul.f32 %v376_v57, %v216_v33 }
 0x22e   :  { %v255_v62 = vmul.f32 %v305_v59, %v244_v58 }
 0x22f   :  { %v378_v60 = vpop.eup %377 }
 0x230   :  { %v380_v61 = vpop.eup %379  ;;  %v245_v63 = vmul.f32 %v378_v60, %v217_v40  ;;  %v266_v4 = vadd.f32 %v306_v0, %v255_v62 }
 0x231   :  { %v246_v1 = vmul.f32 %v380_v61, %v218_v36 }
 0x232   :  { %v256_v2 = vmul.f32 %v305_v59, %v245_v63 }
 0x233   :  { %v382_v3 = vpop.eup %381  ;;  %v257_v6 = vmul.f32 %v305_v59, %v246_v1 }
 0x234   :  { %v267_v5 = vadd.f32 %v306_v0, %v256_v2  ;;  %v247_v7 = vmul.f32 %v382_v3, %v219_v41 }
 0x235   :  { %v268_v10 = vadd.f32 %v306_v0, %v257_v6 }
 0x236   :  { %v326_v8 = vpack.c.bf16 %v267_v5, %v266_v4  ;;  %v258_v9 = vmul.f32 %v305_v59, %v247_v7 }
 0x238   :  { %327 = vst [vmem:[%s475_s6] sm:$0xff] %v326_v8   ;;  %v269_v11 = vadd.f32 %v306_v0, %v258_v9 }
 0x23a   :  { %v331_v12 = vpack.c.bf16 %v269_v11, %v268_v10 }
 0x23c   :  { %334 = vst [vmem:[%s475_s6 + $0x8] sm:$0xff] %v331_v12  }

// kernel: _lambda_.14
= control target key start
LH: loop header
LB: loop body
LE: loop exit
PB: predicated region body
PF: predicated region fallthrough
CT: control target
= control target key end

     0   :  { %s1067_s15 = smov 0   ;;  %s1069_s16 = smov 0   ;;  %s1203_s0 = inlined_call_operand.vmem [shape: bf16[2,16,384], index: 0, kind: input, shape index: {}, may-alias: {0,1,2}]   ;;  %s1204_s1 = inlined_call_operand.vmem [shape: bf16[2,16,384], index: 1, kind: input, shape index: {}, may-alias: {0,1,2}]   ;;  %s1205_s2 = inlined_call_operand.vmem [shape: bf16[2,16,384], index: 2, kind: input, shape index: {}, may-alias: {0,1,2}]   ;;  %s1206_s3 = inlined_call_operand.vmem [shape: f32[2,1,16], index: 3, kind: input, shape index: {}]   ;;  %s1207_s4 = inlined_call_operand.vmem [shape: bf16[2,16,128], index: 4, kind: output, shape index: {}]  }
   0x1   :  { %s1071_s17 = smov 0   ;;  %s1073_s18 = smov 0  }
   0x2   :  { %s1075_s19 = smov 0  }
   0x3 LB: > { %s26_s20 = sadd.s32 1, %s1033_s18  ;;  %p42_p1 = scmp.ne.s32.totalorder %s1025_s16, %s1021_s15  ;;  %s1037_s19 = sphi %s1075_s19, %s14_s19   ;;  %s1033_s18 = sphi %s1073_s18, %s1212_s18   ;;  %s1029_s17 = sphi %s1071_s17, %s1211_s17   ;;  %s1025_s16 = sphi %s1069_s16, %s1210_s16   ;;  %s1021_s15 = sphi %s1067_s15, %s1209_s15  }
   0x4   : > { %p28_p0 = scmp.ge.s32.totalorder %s26_s20, 2  ;;  %p43_p2 = scmp.eq.s32.totalorder %s1037_s19, 0 }
   0x5   : > { %s35_s23 = sadd.s32 1, %s1025_s16  ;;  %p863_p5 = scmp.ge.s32.totalorder %s1037_s19, 2 }
   0x6   : > { %s1214_s20 = smov (%p28_p0, %s26_s20), 0  ;;  %p1098_p3 = por %p43_p2, %p42_p1 }
   0x7   : > { %s30_s22 = ssub.s32 %s1033_s18, %s1214_s20  ;;  %182 = sbr.rel (%p863_p5) target bundleno = 35 (0x23), region = 16 }
   0x8   : > { %p33_p4 = scmp.eq.s32.totalorder %s30_s22, 0 }
   0xa   : > { %s1106_s24 = scalar_select %p33_p4, %s1025_s16, %s35_s23  }
   0xe   : > { %185 = sbr.rel (!%p1098_p3) target bundleno = 21 (0x15), region = 20  ;;  %s187_s25 = sand.u32 (%p1098_p3), 1, %s1025_s16  }
   0xf   : > { %s931_s26 = smul.u32 (%p1098_p3), 24, %s1033_s18  ;;  %s864_s27 = sshll.u32 (%p1098_p3), %s187_s25, 3 }
  0x10   : > { %s189_s5 = scalar_lea.vmem (%p1098_p3), [#allocation2], %s864_s27 }
  0x11   : > { %s193_s30 = scalar_lea.vmem (%p1098_p3), %s1203_s0, %s931_s26 }
  0x12   : > { %v209_v0 = vld [vmem:[%s193_s30] sm:$0xf] (%p1098_p3)  ;;  %v211_v1 = vld [vmem:[%s193_s30 + $0xc] sm:$0xf] (%p1098_p3) }
  0x13   : > { %210 = vst [vmem:[%s189_s5] sm:$0xf] (%p1098_p3), %v209_v0  ;;  %212 = vst [vmem:[%s189_s5 + $0x4] sm:$0xf] (%p1098_p3), %v211_v1 }
  0x15 PF: > { %239 = sbr.rel (!%p1098_p3) target bundleno = 28 (0x1c), region = 61  ;;  %s241_s6 = sand.u32 (%p1098_p3), 1, %s1025_s16  }
  0x16   : > { %s867_s7 = smul.u32 (%p1098_p3), 24, %s1033_s18  ;;  %s866_s8 = sshll.u32 (%p1098_p3), %s241_s6, 3 }
  0x17   : > { %s243_s12 = scalar_lea.vmem (%p1098_p3), [#allocation3], %s866_s8 }
  0x18   : > { %s762_s11 = scalar_lea.vmem (%p1098_p3), %s1204_s1, %s867_s7 }
  0x19   : > { %v868_v2 = vld [vmem:[%s762_s11 + $0x4] sm:$0xf] (%p1098_p3)  ;;  %v869_v3 = vld [vmem:[%s762_s11 + $0x10] sm:$0xf] (%p1098_p3) }
  0x1a   : > { %265 = vst [vmem:[%s243_s12] sm:$0xf] (%p1098_p3), %v868_v2  ;;  %267 = vst [vmem:[%s243_s12 + $0x4] sm:$0xf] (%p1098_p3), %v869_v3 }
  0x1c PF: > { %294 = sbr.rel (!%p1098_p3) target bundleno = 35 (0x23), region = 102  ;;  %s296_s13 = sand.u32 (%p1098_p3), 1, %s1025_s16  }
  0x1d   : > { %s871_s14 = smul.u32 (%p1098_p3), 24, %s1033_s18  ;;  %s870_s22 = sshll.u32 (%p1098_p3), %s296_s13, 3 }
  0x1e   : > { %s298_s27 = scalar_lea.vmem (%p1098_p3), [#allocation4], %s870_s22 }
  0x1f   : > { %s769_s26 = scalar_lea.vmem (%p1098_p3), %s1205_s2, %s871_s14 }
  0x20   : > { %v872_v4 = vld [vmem:[%s769_s26 + $0x8] sm:$0xf] (%p1098_p3)  ;;  %v873_v5 = vld [vmem:[%s769_s26 + $0x14] sm:$0xf] (%p1098_p3) }
  0x21   : > { %320 = vst [vmem:[%s298_s27] sm:$0xf] (%p1098_p3), %v872_v4  ;;  %322 = vst [vmem:[%s298_s27 + $0x4] sm:$0xf] (%p1098_p3), %v873_v5 }
  0x23 PF: > { %p874_p6 = scmp.ge.s32.totalorder %s1037_s19, 1  ;;  %p354_p7 = scmp.lt.s32.totalorder %s1037_s19, 3 }
  0x25   : > { %p355_p8 = pnand %p874_p6, %p354_p7 }
  0x26   : > { %s361_s21 = sand.u32 (!%p355_p8), 1, %s1021_s15   ;;  %v1039_v6 = vmov (!%p355_p8), 0.0   ;;  %vm1040_vm0 = vmmov (!%p355_p8), 0   ;;  %vm447_vm1 = vcmask (!%p355_p8), 523264   ;;  %p416_p9 = scmp.lt.s32.totalorder (!%p355_p8), %s1029_s17, 1  ;;  %v498_v10 = vlaneseq (!%p355_p8) }
  0x27   : > { %358 = sbr.rel (%p355_p8) target bundleno = 1465 (0x5b9), region = 147  ;;  %907 = vmatprep.subr.bf16.mxu0 (!%p355_p8), %v1039_v6  ;;  %s1134_s28 = sshll.u32 (!%p355_p8), %s361_s21, 3  ;;  %909 = vmatprep.mubr.msk.bf16.mxu0 (!%p355_p8), %vm1040_vm0, %v1039_v6  ;;  %vm505_vm2 = vcmask (!%p355_p8), 130048  }
  0x28   : > { %913 = vmatprep.subr.bf16.mxu1 (!%p355_p8), %v1039_v6  ;;  %915 = vmatprep.mubr.msk.bf16.mxu1 (!%p355_p8), %vm1040_vm0, %v1039_v6  ;;  %s370_s15 = scalar_lea.vmem (!%p355_p8), [#allocation3], %s1134_s28  ;;  %s363_s29 = scalar_lea.vmem (!%p355_p8), [#allocation2], %s1134_s28  ;;  %v499_v13 = vshrl.u32 (!%p355_p8), %v498_v10, 7 }
  0x29   : > { %v980_v7 = vld [vmem:[%s370_s15] sm:$0xff] (!%p355_p8)   ;;  %v981_v9 = vld [vmem:[%s363_s29] sm:$0xff] (!%p355_p8)   ;;  %s1041_s7 = smov (!%p355_p8), 64   ;;  %s377_s8 = scalar_lea.vmem (!%p355_p8), [#allocation4], %s1134_s28 }
  0x2a   : > { %v452_v8 = vsel (!%p355_p8), %vm447_vm1, %v980_v7, 0  ;;  %v500_v15 = vsub.s32 (!%p355_p8), 0, %v499_v13  ;;  %v982_v37 = vld [vmem:[%s377_s8] sm:$0xff] (!%p355_p8)  }
  0x2b   : > { %908 = vmatpush3.bf16.xpose.msra.mxu0 (!%p355_p8), %v452_v8  ;;  %914 = vmatpush3.bf16.msra.mxu1 (!%p355_p8), %v982_v37 }
  0x2c   : > { %925 = vmatprep.subr.bf16.mxu0 (!%p355_p8), %v1039_v6  ;;  %919 = vmatprep.subr.bf16.mxu1 (!%p355_p8), %v1039_v6 }
  0x2e   : > { %s1216_s17 = smov (!%p416_p9, %s1029_s17), 1 }
  0x2f   : > { %s418_s6 = scalar_lea.vmem %s1206_s3, %s1216_s17  ;;  %s891_s9 = sshll.u32 %s1216_s17, 3 }
  0x30   : > { %v434_v11 = vld [vmem:[%s418_s6] sm:$0x1]  ;;  %s426_s12 = scalar_lea.vmem %s1207_s4, %s891_s9 }
  0x31   : > { %v435_v12 = vsub.f32 1.0, %v434_v11 }
  0x32   : > { %910 = vmatmul.mubr.msk.bf16.vlgmr.msra.gmra.mrb[0].mxu0 %vm447_vm1, %v981_v9 }
  0x33   : > { %927 = vmatprep.mubr.msk.bf16.mxu0 %vm1040_vm0, %v1039_v6  ;;  %v436_v14 = vmul.f32 -1e+09, %v435_v12 }
  0x35   : > { %v1156_v16 = vrot.slane %v436_v14, %v500_v15 }
 0x105   : > { %v488_v17 = vpop.f32.mrb[0].mxu0 }
 0x106   : > { %v495_v18 = vmul.f32 0.125, %v488_v17  ;;  %v911_v19 = vpop.f32.mrb[1].mxu0 }
 0x107   : > { %v491_v20 = vpop.f32.mrb[2].mxu0 }
 0x108   : > { %v496_v21 = vmul.f32 0.125, %v491_v20  ;;  %v912_v22 = vpop.f32.mrb[3].mxu0  ;;  %v503_v23 = vadd.f32 %v1156_v16, %v495_v18 }
 0x10a   : > { %v506_v24 = vsel %vm505_vm2, %v503_v23, -inf  ;;  %v504_v25 = vadd.f32 %v1156_v16, %v496_v21 }
 0x10b   : > { %507 = vmax.xlane.f32.xlu0 %v506_v24 }
 0x10c   : > { %v509_v26 = vsel %vm505_vm2, %v504_v25, -inf }
 0x10f   : > { %510 = vmax.xlane.f32.xlu0 %v509_v26 }
 0x125   : > { %581 = vrot.lane.b32.xlu0 %v980_v7, %s1041_s7 }
 0x198   : > { %v508_v27 = vpop.xlane.xlu0 %507 }
 0x199   : > { %v512_v28 = vsub.f32 %v503_v23, %v508_v27 }
 0x19b   : > { %v514_v29 = vmul.f32 1.442695, %v512_v28 }
 0x19c   : > { %v511_v30 = vpop.xlane.xlu0 %510 }
 0x19d   : > { %983 = vpow2.f32 %v514_v29  ;;  %v513_v31 = vsub.f32 %v504_v25, %v511_v30 }
 0x19f   : > { %v516_v32 = vmul.f32 1.442695, %v513_v31 }
 0x1a0   : > { %v582_v42 = vpop.permute.xlu0 %581 }
 0x1a1   : > { %985 = vpow2.f32 %v516_v32  ;;  %v587_v45 = vsel %vm447_vm1, %v582_v42, 0 }
 0x1a7   : > { %v984_v33 = vpop.eup %983 }
 0x1a8   : > { %v518_v34 = vsel %vm505_vm2, %v984_v33, 0.0 }
 0x1a9   : > { %519 = vadd.xlane.f32.xlu1 %v518_v34 }
 0x1ab   : > { %v986_v35 = vpop.eup %985 }
 0x1ac   : > { %v521_v36 = vsel %vm505_vm2, %v986_v35, 0.0 }
 0x1ad   : > { %522 = vadd.xlane.f32.xlu1 %v521_v36 }
 0x1be   : > { %579 = vrot.lane.b32.xlu1 %v981_v9, %s1041_s7 }
 0x236   : > { %v520_v38 = vpop.xlane.xlu1 %519 }
 0x237   : > { %987 = vrcp.f32 %v520_v38 }
 0x23a   : > { %v523_v39 = vpop.xlane.xlu1 %522 }
 0x23b   : > { %989 = vrcp.f32 %v523_v39 }
 0x23e   : > { %v580_v47 = vpop.permute.xlu1 %579 }
 0x241   : > { %v988_v40 = vpop.eup %987 }
 0x242   : > { %v526_v43 = vmul.f32 %v988_v40, %v984_v33 }
 0x245   : > { %v990_v41 = vpop.eup %989 }
 0x246   : > { %v527_v44 = vmul.f32 %v990_v41, %v986_v35 }
 0x248   : > { %v528_v46 = vpack.c.bf16 %v527_v44, %v526_v43 }
 0x24a   : > { %916 = vmatmul.mubr.msk.bf16.vlgmr.msra.gmra.mrb[0].mxu1 %vm505_vm2, %v528_v46 }
 0x24b   : > { %920 = vmatpush3.bf16.xpose.msra.mxu1 %v587_v45  ;;  %921 = vmatprep.mubr.msk.bf16.mxu1 %vm1040_vm0, %v1039_v6 }
 0x252   : > { %922 = vmatmul.mubr.msk.bf16.vlgmr.msra.gmra.mrb[4].mxu1 %vm447_vm1, %v580_v47 }
 0x31d   : > { %v572_v48 = vpop.f32.mrb[0].mxu1 }
 0x31e   : > { %v917_v49 = vpop.f32.mrb[1].mxu1 }
 0x31f   : > { %v575_v50 = vpop.f32.mrb[2].mxu1 }
 0x320   : > { %v918_v51 = vpop.f32.mrb[3].mxu1 }
 0x325   : > { %v623_v52 = vpop.f32.mrb[4].mxu1 }
 0x326   : > { %v630_v53 = vmul.f32 0.125, %v623_v52  ;;  %v923_v54 = vpop.f32.mrb[5].mxu1 }
 0x327   : > { %v626_v55 = vpop.f32.mrb[6].mxu1 }
 0x328   : > { %v631_v56 = vmul.f32 0.125, %v626_v55  ;;  %v924_v57 = vpop.f32.mrb[7].mxu1  ;;  %v632_v58 = vadd.f32 %v630_v53, %v1156_v16 }
 0x32a   : > { %v634_v59 = vsel %vm505_vm2, %v632_v58, -inf  ;;  %v633_v60 = vadd.f32 %v631_v56, %v1156_v16 }
 0x32b   : > { %635 = vmax.xlane.f32.xlu1 %v634_v59 }
 0x32c   : > { %v637_v61 = vsel %vm505_vm2, %v633_v60, -inf }
 0x32d   : > { %638 = vmax.xlane.f32.xlu0 %v637_v61 }
 0x3b8   : > { %v636_v62 = vpop.xlane.xlu1 %635 }
 0x3b9   : > { %v640_v63 = vsub.f32 %v632_v58, %v636_v62 }
 0x3ba   : > { %v639_v0 = vpop.xlane.xlu0 %638 }
 0x3bb   : > { %v642_v1 = vmul.f32 1.442695, %v640_v63  ;;  %v641_v2 = vsub.f32 %v633_v60, %v639_v0 }
 0x3bd   : > { %991 = vpow2.f32 %v642_v1  ;;  %v644_v3 = vmul.f32 1.442695, %v641_v2 }
 0x3bf   : > { %993 = vpow2.f32 %v644_v3 }
 0x3c7   : > { %v992_v4 = vpop.eup %991 }
 0x3c8   : > { %v646_v5 = vsel %vm505_vm2, %v992_v4, 0.0 }
 0x3c9   : > { %v994_v6 = vpop.eup %993  ;;  %647 = vadd.xlane.f32.xlu0 %v646_v5 }
 0x3ca   : > { %v649_v7 = vsel %vm505_vm2, %v994_v6, 0.0 }
 0x3cb   : > { %650 = vadd.xlane.f32.xlu1 %v649_v7 }
 0x3df   : > { %657 = vrot.lane.b32.xlu0 %v982_v37, %s1041_s7 }
 0x456   : > { %v648_v8 = vpop.xlane.xlu0 %647 }
 0x457   : > { %995 = vrcp.f32 %v648_v8 }
 0x458   : > { %v651_v9 = vpop.xlane.xlu1 %650 }
 0x459   : > { %997 = vrcp.f32 %v651_v9 }
 0x45a   : > { %v658_v10 = vpop.permute.xlu0 %657 }
 0x45b   : > { %926 = vmatpush3.bf16.msra.mxu0 %v658_v10 }
 0x461   : > { %v996_v11 = vpop.eup %995 }
 0x462   : > { %v654_v13 = vmul.f32 %v996_v11, %v992_v4 }
 0x463   : > { %v998_v12 = vpop.eup %997 }
 0x464   : > { %v655_v14 = vmul.f32 %v998_v12, %v994_v6 }
 0x466   : > { %v656_v15 = vpack.c.bf16 %v655_v14, %v654_v13 }
 0x468   : > { %928 = vmatmul.mubr.msk.bf16.vlgmr.msra.gmra.mrb[4].mxu0 %vm505_vm2, %v656_v15 }
 0x53b   : > { %v697_v16 = vpop.f32.mrb[4].mxu0 }
 0x53c   : > { %v929_v17 = vpop.f32.mrb[5].mxu0 }
 0x53d   : > { %v700_v18 = vpop.f32.mrb[6].mxu0 }
 0x53e   : > { %v975_v19 = vpack.i.bf16 %v700_v18, %v697_v16  ;;  %v930_v20 = vpop.f32.mrb[7].mxu0 }
 0x540   : > { %976 = vrot.lane.b32.xlu1 %v975_v19, %s1041_s7 }
 0x5b2   : > { %v977_v21 = vpop.permute.xlu1 %976 }
 0x5b3   : > { %v979_v22 = vunpack.i.h.bf16 %v977_v21  ;;  %v978_v23 = vunpack.i.l.bf16 %v977_v21 }
 0x5b5   : > { %v713_v24 = vsel %vm447_vm1, %v575_v50, %v979_v22  ;;  %v712_v25 = vsel %vm447_vm1, %v572_v48, %v978_v23 }
 0x5b6   : > { %v897_v26 = vpack.c.bf16 %v713_v24, %v712_v25 }
 0x5b8   : > { %898 = vst [vmem:[%s426_s12] sm:$0xff] %v897_v26  }
 0x5b9 PF: > { %s14_s19 = sadd.s32 1, %s1037_s19   ;;  %s1209_s15 = smov %s1025_s16 }
 0x5ba   : > { %p11_p10 = scmp.ge.s32.totalorder %s14_s19, 4   ;;  %s1210_s16 = smov %s1106_s24 }
 0x5bb   : > { %s1211_s17 = smov %s1033_s18  ;;  %s1212_s18 = smov %s1214_s20 }
 0x5bc   :  { %13 = sbr.rel (!%p11_p10) target bundleno = 3 (0x3), region = 213 }

// kernel: _lambda_.13
= control target key start
LH: loop header
LB: loop body
LE: loop exit
PB: predicated region body
PF: predicated region fallthrough
CT: control target
= control target key end

     0   :  { %v548_v1 = vmov 0   ;;  %v362_v27 = vlaneseq  ;;  %s674_s1 = inlined_call_operand.vmem [shape: bf16[128,384], index: 1, kind: input, shape index: {}]   ;;  %s675_s0 = inlined_call_operand.vmem [shape: bf16[32,128], index: 0, kind: input, shape index: {}]   ;;  %s676_s2 = inlined_call_operand.vmem [shape: f32[1,384], index: 2, kind: input, shape index: {}]   ;;  %s677_s3 = inlined_call_operand.vmem [shape: bf16[32,384], index: 3, kind: output, shape index: {}]  }
   0x1   :  { %v514_v0 = vld [vmem:[%s674_s1 + $0x4] ss:$12 sps:$4 sm:$0xff]   ;;  %251 = vmatprep.mubr.bf16.mxu0 %v548_v1  ;;  %v516_v2 = vld [vmem:[%s674_s1] ss:$12 sps:$4 sm:$0xff]   ;;  %v517_v3 = vld [vmem:[%s674_s1 + $0x1c] ss:$12 sps:$4 sm:$0xff]  }
   0x2   :  { %219 = vmatprep.subr.bf16.mxu0 %v514_v0  ;;  %v519_v4 = vld [vmem:[%s674_s1 + $0x18] ss:$12 sps:$4 sm:$0xff]   ;;  %v520_v5 = vld [vmem:[%s674_s1 + $0x8] ss:$12 sps:$4 sm:$0xff]   ;;  %v524_v7 = vld [vmem:[%s674_s1 + $0x20] ss:$12 sps:$4 sm:$0xff]  }
   0x3   :  { %220 = vmatpush1.bf16.msra.mxu0 %v516_v2  ;;  %v521_v6 = vld [vmem:[%s674_s1 + $0x34] ss:$12 sps:$4 sm:$0xff]   ;;  %493 = vmatprep.subr.bf16.mxu1 %v520_v5  ;;  %v523_v8 = vld [vmem:[%s674_s1 + $0x30] ss:$12 sps:$4 sm:$0xff]   ;;  %v525_v9 = vld [vmem:[%s674_s1 + $0x4c] ss:$12 sps:$4 sm:$0xff]  }
   0x4   :  { %221 = vmatprep.subr.bf16.mxu0 %v517_v3  ;;  %494 = vmatpush3.bf16.msra.mxu1 %v520_v5  ;;  %v528_v10 = vld [vmem:[%s674_s1 + $0x38] ss:$12 sps:$4 sm:$0xff]   ;;  %v527_v11 = vld [vmem:[%s674_s1 + $0x48] ss:$12 sps:$4 sm:$0xff]   ;;  %v532_v12 = vld [vmem:[%s674_s1 + $0x50] ss:$12 sps:$4 sm:$0xff]  }
   0x5   :  { %495 = vmatprep.subr.bf16.mxu1 %v524_v7  ;;  %v529_v13 = vld [vmem:[%s674_s1 + $0x64] ss:$12 sps:$4 sm:$0xff]   ;;  %v531_v14 = vld [vmem:[%s674_s1 + $0x60] ss:$12 sps:$4 sm:$0xff]   ;;  %v536_v15 = vld [vmem:[%s674_s1 + $0x68] ss:$12 sps:$4 sm:$0xff]  }
   0x6   :  { %v533_v16 = vld [vmem:[%s674_s1 + $0x7c] ss:$12 sps:$4 sm:$0xff]   ;;  %v535_v17 = vld [vmem:[%s674_s1 + $0x78] ss:$12 sps:$4 sm:$0xff]   ;;  %v540_v19 = vld [vmem:[%s674_s1 + $0x80] ss:$12 sps:$4 sm:$0xff]  }
   0x7   :  { %222 = vmatpush1.bf16.msra.mxu0 %v519_v4  ;;  %v545_v18 = vld [vmem:[%s675_s0] sm:$0xff]   ;;  %v539_v21 = vld [vmem:[%s674_s1 + $0x90] ss:$12 sps:$4 sm:$0xff]   ;;  %v541_v23 = vld [vmem:[%s674_s1 + $0xac] ss:$12 sps:$4 sm:$0xff]   ;;  %v363_v28 = vshrl.u32 %v362_v27, 7 }
   0x8   :  { %223 = vmatprep.subr.bf16.mxu0 %v521_v6  ;;  %496 = vmatpush3.bf16.msra.mxu1 %v524_v7  ;;  %v537_v20 = vld [vmem:[%s674_s1 + $0x94] ss:$12 sps:$4 sm:$0xff]   ;;  %v544_v22 = vld [vmem:[%s674_s1 + $0x98] ss:$12 sps:$4 sm:$0xff]   ;;  %v546_v25 = vld [vmem:[%s674_s1 + $0xb0] ss:$12 sps:$4 sm:$0xff]  }
   0x9   :  { %497 = vmatprep.subr.bf16.mxu1 %v528_v10  ;;  %509 = vmatprep.mubr.bf16.mxu1 %v545_v18  ;;  %v543_v24 = vld [vmem:[%s674_s1 + $0xa8] ss:$12 sps:$4 sm:$0xff]   ;;  %v364_v29 = vsub.s32 0, %v363_v28  ;;  %v360_v30 = vld [vmem:[%s676_s2] sm:$0x7]  ;;  %v368_v31 = vsub.s32 1, %v363_v28 }
   0xa   :  { %v547_v26 = vld [vmem:[%s675_s0 + $0x8] sm:$0xff]   ;;  %v372_v32 = vsub.s32 2, %v363_v28 }
   0xb   :  { %224 = vmatpush1.bf16.msra.mxu0 %v523_v8  ;;  %v365_v33 = vrot.slane %v360_v30, %v364_v29  ;;  %v369_v34 = vrot.slane %v360_v30, %v368_v31 }
   0xc   :  { %225 = vmatprep.subr.bf16.mxu0 %v525_v9  ;;  %498 = vmatpush3.bf16.msra.mxu1 %v528_v10  ;;  %v373_v36 = vrot.slane %v360_v30, %v372_v32 }
   0xd   :  { %499 = vmatprep.subr.bf16.mxu1 %v532_v12 }
   0xf   :  { %226 = vmatpush1.bf16.msra.mxu0 %v527_v11 }
  0x10   :  { %227 = vmatprep.subr.bf16.mxu0 %v529_v13  ;;  %500 = vmatpush3.bf16.msra.mxu1 %v532_v12 }
  0x11   :  { %501 = vmatprep.subr.bf16.mxu1 %v536_v15 }
  0x13   :  { %228 = vmatpush1.bf16.msra.mxu0 %v531_v14 }
  0x14   :  { %229 = vmatprep.subr.bf16.mxu0 %v533_v16  ;;  %502 = vmatpush3.bf16.msra.mxu1 %v536_v15 }
  0x15   :  { %503 = vmatprep.subr.bf16.mxu1 %v540_v19 }
  0x17   :  { %230 = vmatpush1.bf16.msra.mxu0 %v535_v17 }
  0x18   :  { %231 = vmatprep.subr.bf16.mxu0 %v537_v20  ;;  %504 = vmatpush3.bf16.msra.mxu1 %v540_v19 }
  0x19   :  { %505 = vmatprep.subr.bf16.mxu1 %v544_v22 }
  0x1b   :  { %232 = vmatpush1.bf16.msra.mxu0 %v539_v21 }
  0x1c   :  { %233 = vmatprep.subr.bf16.mxu0 %v541_v23  ;;  %506 = vmatpush3.bf16.msra.mxu1 %v544_v22 }
  0x1d   :  { %507 = vmatprep.subr.bf16.mxu1 %v546_v25 }
  0x1f   :  { %234 = vmatpush1.bf16.msra.mxu0 %v543_v24 }
  0x20   :  { %508 = vmatpush3.bf16.msra.mxu1 %v546_v25 }
  0x22   :  { %252 = vmatmul.mubr.bf16.vlgmr.msra.gmra.mrb[0].mxu0 %v545_v18 }
  0x23   :  { %261 = vmatprep.mubr.bf16.mxu0 %v548_v1  ;;  %510 = vmatmul.mubr.bf16.vlgmr.msra.gmra.mrb[0].mxu1 %v547_v26 }
  0x2a   :  { %262 = vmatmul.mubr.bf16.gmra.mrb[4].mxu0 %v547_v26 }
  0xf5   :  { %v253_v35 = vpop.f32.mrb[0].mxu0 }
  0xf6   :  { %v377_v37 = vadd.f32 %v365_v33, %v253_v35  ;;  %v255_v38 = vpop.f32.mrb[1].mxu0  ;;  %v511_v43 = vpop.f32.mrb[0].mxu1 }
  0xf7   :  { %v378_v39 = vadd.f32 %v369_v34, %v255_v38  ;;  %v257_v40 = vpop.f32.mrb[2].mxu0  ;;  %v385_v46 = vadd.f32 %v511_v43, %v373_v36  ;;  %v306_v47 = vpop.f32.mrb[1].mxu1 }
  0xf8   :  { %v380_v41 = vadd.f32 %v365_v33, %v257_v40  ;;  %v259_v42 = vpop.f32.mrb[3].mxu0  ;;  %v379_v48 = vadd.f32 %v373_v36, %v306_v47  ;;  %v512_v49 = vpop.f32.mrb[2].mxu1 }
  0xf9   :  { %v475_v44 = vpack.c.bf16 %v378_v39, %v377_v37  ;;  %v381_v45 = vadd.f32 %v369_v34, %v259_v42  ;;  %v480_v51 = vpack.c.bf16 %v385_v46, %v385_v46  ;;  %v388_v52 = vadd.f32 %v512_v49, %v373_v36  ;;  %v309_v53 = vpop.f32.mrb[3].mxu1 }
  0xfa   :  { %v476_v54 = vpack.c.bf16 %v379_v48, %v379_v48  ;;  %v382_v55 = vadd.f32 %v373_v36, %v309_v53 }
  0xfb   :  { %429 = vst [vmem:[%s677_s3] sm:$0xff] %v475_v44  ;;  %v477_v50 = vpack.c.bf16 %v381_v45, %v380_v41  ;;  %434 = vst [vmem:[%s677_s3 + $0x20] sm:$0xf] %v480_v51  ;;  %v482_v56 = vpack.c.bf16 %v388_v52, %v388_v52 }
  0xfc   :  { %430 = vst [vmem:[%s677_s3 + $0x8] sm:$0xf] %v476_v54  ;;  %v478_v59 = vpack.c.bf16 %v382_v55, %v382_v55 }
  0xfd   :  { %431 = vst [vmem:[%s677_s3 + $0xc] sm:$0xff] %v477_v50  ;;  %v263_v57 = vpop.f32.mrb[4].mxu0  ;;  %436 = vst [vmem:[%s677_s3 + $0x2c] sm:$0xf] %v482_v56 }
  0xfe   :  { %v383_v58 = vadd.f32 %v365_v33, %v263_v57  ;;  %v265_v60 = vpop.f32.mrb[5].mxu0  ;;  %432 = vst [vmem:[%s677_s3 + $0x14] sm:$0xf] %v478_v59 }
  0xff   :  { %v384_v61 = vadd.f32 %v369_v34, %v265_v60  ;;  %v267_v62 = vpop.f32.mrb[6].mxu0 }
 0x100   :  { %v386_v63 = vadd.f32 %v365_v33, %v267_v62  ;;  %v269_v0 = vpop.f32.mrb[7].mxu0 }
 0x101   :  { %v479_v1 = vpack.c.bf16 %v384_v61, %v383_v58  ;;  %v387_v2 = vadd.f32 %v369_v34, %v269_v0 }
 0x103   :  { %433 = vst [vmem:[%s677_s3 + $0x18] sm:$0xff] %v479_v1  ;;  %v481_v3 = vpack.c.bf16 %v387_v2, %v386_v63 }
 0x105   :  { %435 = vst [vmem:[%s677_s3 + $0x24] sm:$0xff] %v481_v3 }

// kernel: _lambda_.16
= control target key start
LH: loop header
LB: loop body
LE: loop exit
PB: predicated region body
PF: predicated region fallthrough
CT: control target
= control target key end

     0   :  { %v436_v1 = vmov 0   ;;  %v229_v19 = vlaneseq  ;;  %s582_s1 = inlined_call_operand.vmem [shape: bf16[128,256], index: 1, kind: input, shape index: {}]   ;;  %s583_s0 = inlined_call_operand.vmem [shape: bf16[32,128], index: 0, kind: input, shape index: {}]   ;;  %s584_s2 = inlined_call_operand.vmem [shape: f32[1,256], index: 2, kind: input, shape index: {}]   ;;  %s585_s3 = inlined_call_operand.vmem [shape: bf16[32,256], index: 3, kind: output, shape index: {}]  }
   0x1   :  { %v394_v0 = vld [vmem:[%s582_s1 + $0x4] ss:$8 sps:$4 sm:$0xff]   ;;  %179 = vmatprep.mubr.bf16.mxu0 %v436_v1  ;;  %189 = vmatprep.mubr.bf16.mxu1 %v436_v1  ;;  %v396_v2 = vld [vmem:[%s582_s1] ss:$8 sps:$4 sm:$0xff]   ;;  %v397_v3 = vld [vmem:[%s582_s1 + $0x14] ss:$8 sps:$4 sm:$0xff]  }
   0x2   :  { %147 = vmatprep.subr.bf16.mxu0 %v394_v0  ;;  %377 = vmatprep.subr.bf16.mxu1 %v394_v0  ;;  %v399_v4 = vld [vmem:[%s582_s1 + $0x10] ss:$8 sps:$4 sm:$0xff]   ;;  %v400_v5 = vld [vmem:[%s582_s1 + $0x24] ss:$8 sps:$4 sm:$0xff]   ;;  %v402_v6 = vld [vmem:[%s582_s1 + $0x20] ss:$8 sps:$4 sm:$0xff]  }
   0x3   :  { %148 = vmatpush1.bf16.msra.mxu0 %v396_v2  ;;  %385 = vmatpush1.bf16.msra.mxu1 %v396_v2  ;;  %v403_v7 = vld [vmem:[%s582_s1 + $0x34] ss:$8 sps:$4 sm:$0xff]   ;;  %v405_v8 = vld [vmem:[%s582_s1 + $0x30] ss:$8 sps:$4 sm:$0xff]   ;;  %v406_v9 = vld [vmem:[%s582_s1 + $0x44] ss:$8 sps:$4 sm:$0xff]  }
   0x4   :  { %149 = vmatprep.subr.bf16.mxu0 %v397_v3  ;;  %378 = vmatprep.subr.bf16.mxu1 %v397_v3  ;;  %v408_v10 = vld [vmem:[%s582_s1 + $0x40] ss:$8 sps:$4 sm:$0xff]   ;;  %v409_v11 = vld [vmem:[%s582_s1 + $0x54] ss:$8 sps:$4 sm:$0xff]   ;;  %v411_v12 = vld [vmem:[%s582_s1 + $0x50] ss:$8 sps:$4 sm:$0xff]  }
   0x5   :  { %v412_v13 = vld [vmem:[%s582_s1 + $0x64] ss:$8 sps:$4 sm:$0xff]   ;;  %v414_v14 = vld [vmem:[%s582_s1 + $0x60] ss:$8 sps:$4 sm:$0xff]   ;;  %v415_v15 = vld [vmem:[%s582_s1 + $0x74] ss:$8 sps:$4 sm:$0xff]  }
   0x6   :  { %v417_v16 = vld [vmem:[%s582_s1 + $0x70] ss:$8 sps:$4 sm:$0xff]   ;;  %v418_v17 = vld [vmem:[%s583_s0] sm:$0xff]   ;;  %v419_v18 = vld [vmem:[%s583_s0 + $0x8] sm:$0xff]   ;;  %v230_v20 = vshrl.u32 %v229_v19, 7 }
   0x7   :  { %150 = vmatpush1.bf16.msra.mxu0 %v399_v4  ;;  %386 = vmatpush1.bf16.msra.mxu1 %v399_v4  ;;  %v227_v22 = vld [vmem:[%s584_s2] sm:$0x3] }
   0x8   :  { %151 = vmatprep.subr.bf16.mxu0 %v400_v5  ;;  %379 = vmatprep.subr.bf16.mxu1 %v400_v5  ;;  %v231_v21 = vsub.s32 0, %v230_v20  ;;  %v235_v23 = vsub.s32 1, %v230_v20 }
   0xa   :  { %v232_v24 = vrot.slane %v227_v22, %v231_v21  ;;  %v236_v25 = vrot.slane %v227_v22, %v235_v23 }
   0xb   :  { %152 = vmatpush1.bf16.msra.mxu0 %v402_v6  ;;  %387 = vmatpush1.bf16.msra.mxu1 %v402_v6 }
   0xc   :  { %153 = vmatprep.subr.bf16.mxu0 %v403_v7  ;;  %380 = vmatprep.subr.bf16.mxu1 %v403_v7 }
   0xf   :  { %154 = vmatpush1.bf16.msra.mxu0 %v405_v8  ;;  %388 = vmatpush1.bf16.msra.mxu1 %v405_v8 }
  0x10   :  { %155 = vmatprep.subr.bf16.mxu0 %v406_v9  ;;  %381 = vmatprep.subr.bf16.mxu1 %v406_v9 }
  0x13   :  { %156 = vmatpush1.bf16.msra.mxu0 %v408_v10  ;;  %389 = vmatpush1.bf16.msra.mxu1 %v408_v10 }
  0x14   :  { %157 = vmatprep.subr.bf16.mxu0 %v409_v11  ;;  %382 = vmatprep.subr.bf16.mxu1 %v409_v11 }
  0x17   :  { %158 = vmatpush1.bf16.msra.mxu0 %v411_v12  ;;  %390 = vmatpush1.bf16.msra.mxu1 %v411_v12 }
  0x18   :  { %159 = vmatprep.subr.bf16.mxu0 %v412_v13  ;;  %383 = vmatprep.subr.bf16.mxu1 %v412_v13 }
  0x1b   :  { %160 = vmatpush1.bf16.msra.mxu0 %v414_v14  ;;  %391 = vmatpush1.bf16.msra.mxu1 %v414_v14 }
  0x1c   :  { %161 = vmatprep.subr.bf16.mxu0 %v415_v15  ;;  %384 = vmatprep.subr.bf16.mxu1 %v415_v15 }
  0x1f   :  { %162 = vmatpush1.bf16.msra.mxu0 %v417_v16  ;;  %392 = vmatpush1.bf16.msra.mxu1 %v417_v16 }
  0x22   :  { %180 = vmatmul.mubr.bf16.vlgmr.msra.gmra.mrb[0].mxu0 %v418_v17  ;;  %190 = vmatmul.mubr.bf16.vlgmr.msra.gmra.mrb[0].mxu1 %v419_v18 }
  0xf5   :  { %v181_v26 = vpop.f32.mrb[0].mxu0  ;;  %v191_v27 = vpop.f32.mrb[0].mxu1 }
  0xf6   :  { %v514_v28 = vadd.f32 %v232_v24, %v181_v26  ;;  %v516_v29 = vadd.f32 %v232_v24, %v191_v27  ;;  %v183_v30 = vpop.f32.mrb[1].mxu0  ;;  %v193_v31 = vpop.f32.mrb[1].mxu1 }
  0xf7   :  { %v518_v32 = vadd.f32 %v236_v25, %v183_v30  ;;  %v520_v33 = vadd.f32 %v236_v25, %v193_v31  ;;  %v185_v34 = vpop.f32.mrb[2].mxu0  ;;  %v195_v35 = vpop.f32.mrb[2].mxu1 }
  0xf8   :  { %v247_v36 = vmul.f32 %v514_v28, %v514_v28  ;;  %v251_v37 = vmul.f32 %v516_v29, %v516_v29  ;;  %v526_v38 = vadd.f32 %v232_v24, %v185_v34  ;;  %v528_v39 = vadd.f32 %v232_v24, %v195_v35  ;;  %v187_v40 = vpop.f32.mrb[3].mxu0  ;;  %v197_v41 = vpop.f32.mrb[3].mxu1 }
  0xf9   :  { %v248_v42 = vmul.f32 %v518_v32, %v518_v32  ;;  %v252_v43 = vmul.f32 %v520_v33, %v520_v33  ;;  %v534_v44 = vadd.f32 %v236_v25, %v187_v40  ;;  %v536_v45 = vadd.f32 %v236_v25, %v197_v41 }
  0xfa   :  { %v255_v46 = vmul.f32 %v247_v36, %v514_v28  ;;  %v259_v47 = vmul.f32 %v251_v37, %v516_v29  ;;  %v249_v48 = vmul.f32 %v526_v38, %v526_v38  ;;  %v253_v49 = vmul.f32 %v528_v39, %v528_v39 }
  0xfb   :  { %v256_v50 = vmul.f32 %v248_v42, %v518_v32  ;;  %v260_v51 = vmul.f32 %v252_v43, %v520_v33  ;;  %v250_v52 = vmul.f32 %v534_v44, %v534_v44  ;;  %v254_v53 = vmul.f32 %v536_v45, %v536_v45 }
  0xfc   :  { %v263_v54 = vmul.f32 0.044715, %v255_v46  ;;  %v267_v55 = vmul.f32 0.044715, %v259_v47  ;;  %v257_v56 = vmul.f32 %v249_v48, %v526_v38  ;;  %v261_v57 = vmul.f32 %v253_v49, %v528_v39 }
  0xfd   :  { %v264_v58 = vmul.f32 0.044715, %v256_v50  ;;  %v268_v59 = vmul.f32 0.044715, %v260_v51  ;;  %v258_v60 = vmul.f32 %v250_v52, %v534_v44  ;;  %v262_v61 = vmul.f32 %v254_v53, %v536_v45 }
  0xfe   :  { %v271_v62 = vadd.f32 %v263_v54, %v514_v28  ;;  %v275_v63 = vadd.f32 %v267_v55, %v516_v29  ;;  %v265_v0 = vmul.f32 0.044715, %v257_v56  ;;  %v269_v1 = vmul.f32 0.044715, %v261_v57 }
  0xff   :  { %v272_v2 = vadd.f32 %v264_v58, %v518_v32  ;;  %v276_v3 = vadd.f32 %v268_v59, %v520_v33  ;;  %v266_v4 = vmul.f32 0.044715, %v258_v60  ;;  %v270_v5 = vmul.f32 0.044715, %v262_v61 }
 0x100   :  { %v279_v6 = vmul.f32 0.7978846, %v271_v62  ;;  %v283_v7 = vmul.f32 0.7978846, %v275_v63  ;;  %v273_v8 = vadd.f32 %v265_v0, %v526_v38  ;;  %v277_v9 = vadd.f32 %v269_v1, %v528_v39 }
 0x101   :  { %v280_v10 = vmul.f32 0.7978846, %v272_v2  ;;  %v284_v11 = vmul.f32 0.7978846, %v276_v3  ;;  %v274_v12 = vadd.f32 %v266_v4, %v534_v44  ;;  %v278_v13 = vadd.f32 %v270_v5, %v536_v45 }
 0x102   :  { %420 = vtanh.f32 %v279_v6  ;;  %v281_v14 = vmul.f32 0.7978846, %v273_v8  ;;  %v285_v15 = vmul.f32 0.7978846, %v277_v9 }
 0x103   :  { %422 = vtanh.f32 %v283_v7  ;;  %v282_v16 = vmul.f32 0.7978846, %v274_v12  ;;  %v286_v17 = vmul.f32 0.7978846, %v278_v13 }
 0x104   :  { %424 = vtanh.f32 %v280_v10 }
 0x105   :  { %426 = vtanh.f32 %v284_v11 }
 0x106   :  { %428 = vtanh.f32 %v281_v14 }
 0x107   :  { %430 = vtanh.f32 %v285_v15 }
 0x108   :  { %432 = vtanh.f32 %v282_v16 }
 0x109   :  { %434 = vtanh.f32 %v286_v17 }
 0x10c   :  { %v421_v18 = vpop.eup %420 }
 0x10d   :  { %v423_v19 = vpop.eup %422  ;;  %v295_v20 = vadd.f32 1.0, %v421_v18 }
 0x10e   :  { %v425_v21 = vpop.eup %424  ;;  %v299_v22 = vadd.f32 1.0, %v423_v19 }
 0x10f   :  { %v427_v23 = vpop.eup %426  ;;  %v303_v24 = vmul.f32 0.5, %v295_v20  ;;  %v296_v25 = vadd.f32 1.0, %v425_v21 }
 0x110   :  { %v429_v26 = vpop.eup %428  ;;  %v307_v27 = vmul.f32 0.5, %v299_v22  ;;  %v300_v30 = vadd.f32 1.0, %v427_v23 }
 0x111   :  { %v431_v31 = vpop.eup %430  ;;  %v311_v34 = vmul.f32 %v303_v24, %v514_v28  ;;  %v304_v35 = vmul.f32 0.5, %v296_v25  ;;  %v297_v36 = vadd.f32 1.0, %v429_v26 }
 0x112   :  { %v433_v37 = vpop.eup %432  ;;  %v315_v40 = vmul.f32 %v307_v27, %v516_v29  ;;  %v308_v41 = vmul.f32 0.5, %v300_v30  ;;  %v301_v42 = vadd.f32 1.0, %v431_v31 }
 0x113   :  { %v435_v43 = vpop.eup %434  ;;  %v312_v46 = vmul.f32 %v304_v35, %v518_v32  ;;  %v305_v47 = vmul.f32 0.5, %v297_v36  ;;  %v298_v48 = vadd.f32 1.0, %v433_v37 }
 0x114   :  { %v316_v49 = vmul.f32 %v308_v41, %v520_v33  ;;  %v309_v50 = vmul.f32 0.5, %v301_v42  ;;  %v302_v51 = vadd.f32 1.0, %v435_v43 }
 0x115   :  { %v373_v52 = vpack.c.bf16 %v312_v46, %v311_v34  ;;  %v313_v53 = vmul.f32 %v305_v47, %v526_v38  ;;  %v306_v28 = vmul.f32 0.5, %v298_v48 }
 0x116   :  { %v375_v54 = vpack.c.bf16 %v316_v49, %v315_v40  ;;  %v317_v55 = vmul.f32 %v309_v50, %v528_v39  ;;  %v310_v56 = vmul.f32 0.5, %v302_v51 }
 0x117   :  { %343 = vst [vmem:[%s585_s3] sm:$0xff] %v373_v52  ;;  %v314_v29 = vmul.f32 %v306_v28, %v534_v44 }
 0x118   :  { %345 = vst [vmem:[%s585_s3 + $0x10] sm:$0xff] %v375_v54  ;;  %v318_v32 = vmul.f32 %v310_v56, %v536_v45 }
 0x119   :  { %v374_v33 = vpack.c.bf16 %v314_v29, %v313_v53 }
 0x11a   :  { %v376_v57 = vpack.c.bf16 %v318_v32, %v317_v55 }
 0x11b   :  { %344 = vst [vmem:[%s585_s3 + $0x8] sm:$0xff] %v374_v33 }
 0x11c   :  { %346 = vst [vmem:[%s585_s3 + $0x18] sm:$0xff] %v376_v57 }

// kernel: _lambda_.23
= control target key start
LH: loop header
LB: loop body
LE: loop exit
PB: predicated region body
PF: predicated region fallthrough
CT: control target
= control target key end

     0   :  { %s306_s1 = inlined_call_operand.vmem [shape: bf16[128,128], index: 1, kind: input, shape index: {}]   ;;  %s307_s0 = inlined_call_operand.vmem [shape: bf16[32,128], index: 0, kind: input, shape index: {}]   ;;  %s308_s2 = inlined_call_operand.vmem [shape: f32[1,128], index: 2, kind: input, shape index: {}]   ;;  %s309_s3 = inlined_call_operand.vmem [shape: f32[32,128], index: 3, kind: output, shape index: {}]  }
   0x1   :  { %v231_v0 = vld [vmem:[%s306_s1] sm:$0xff]   ;;  %v232_v1 = vld [vmem:[%s306_s1 + $0x8] sm:$0xff]   ;;  %v233_v2 = vld [vmem:[%s306_s1 + $0x10] sm:$0xff]  }
   0x2   :  { %211 = vmatprep.subr.bf16.mxu0 %v231_v0  ;;  %v234_v3 = vld [vmem:[%s306_s1 + $0x18] sm:$0xff]   ;;  %v239_v4 = vld [vmem:[%s307_s0] sm:$0xff]   ;;  %v236_v6 = vld [vmem:[%s306_s1 + $0x28] sm:$0xff]  }
   0x3   :  { %212 = vmatpush3.bf16.msra.mxu0 %v231_v0  ;;  %227 = vmatprep.mubr.bf16.mxu0 %v239_v4  ;;  %v235_v5 = vld [vmem:[%s306_s1 + $0x20] sm:$0xff]   ;;  %v237_v7 = vld [vmem:[%s306_s1 + $0x30] sm:$0xff]   ;;  %v238_v8 = vld [vmem:[%s306_s1 + $0x38] sm:$0xff]  }
   0x4   :  { %213 = vmatprep.subr.bf16.mxu0 %v232_v1  ;;  %v240_v9 = vld [vmem:[%s307_s0 + $0x8] sm:$0xff]   ;;  %v200_v10 = vld [vmem:[%s308_s2] ss:$0 sm:$0xff] }
   0x7   :  { %214 = vmatpush3.bf16.msra.mxu0 %v232_v1 }
   0x8   :  { %215 = vmatprep.subr.bf16.mxu0 %v233_v2 }
   0xb   :  { %216 = vmatpush3.bf16.msra.mxu0 %v233_v2 }
   0xc   :  { %217 = vmatprep.subr.bf16.mxu0 %v234_v3 }
   0xf   :  { %218 = vmatpush3.bf16.msra.mxu0 %v234_v3 }
  0x10   :  { %219 = vmatprep.subr.bf16.mxu0 %v235_v5 }
  0x13   :  { %220 = vmatpush3.bf16.msra.mxu0 %v235_v5 }
  0x14   :  { %221 = vmatprep.subr.bf16.mxu0 %v236_v6 }
  0x17   :  { %222 = vmatpush3.bf16.msra.mxu0 %v236_v6 }
  0x18   :  { %223 = vmatprep.subr.bf16.mxu0 %v237_v7 }
  0x1b   :  { %224 = vmatpush3.bf16.msra.mxu0 %v237_v7 }
  0x1c   :  { %225 = vmatprep.subr.bf16.mxu0 %v238_v8 }
  0x1f   :  { %226 = vmatpush3.bf16.msra.mxu0 %v238_v8 }
  0x22   :  { %228 = vmatmul.mubr.bf16.vlgmr.msra.gmra.mrb[0].mxu0 %v240_v9 }
  0xf5   :  { %v229_v11 = vpop.f32.mrb[0].mxu0 }
  0xf6   :  { %v180_v12 = vadd.f32 %v229_v11, %v200_v10  ;;  %v141_v13 = vpop.f32.mrb[1].mxu0 }
  0xf7   :  { %v178_v14 = vadd.f32 %v200_v10, %v141_v13  ;;  %v230_v15 = vpop.f32.mrb[2].mxu0 }
  0xf8   :  { %184 = vst [vmem:[%s309_s3 + $0x10] sm:$0xff] %v180_v12  ;;  %v181_v16 = vadd.f32 %v230_v15, %v200_v10  ;;  %v144_v17 = vpop.f32.mrb[3].mxu0 }
  0xf9   :  { %182 = vst [vmem:[%s309_s3] sm:$0xff] %v178_v14  ;;  %v179_v18 = vadd.f32 %v200_v10, %v144_v17 }
  0xfa   :  { %185 = vst [vmem:[%s309_s3 + $0x18] sm:$0xff] %v181_v16 }
  0xfb   :  { %183 = vst [vmem:[%s309_s3 + $0x8] sm:$0xff] %v179_v18 }

// kernel: _lambda_.17
= control target key start
LH: loop header
LB: loop body
LE: loop exit
PB: predicated region body
PF: predicated region fallthrough
CT: control target
= control target key end

     0   :  { %s607_s1 = inlined_call_operand.vmem [shape: bf16[256,128], index: 1, kind: input, shape index: {}]   ;;  %s608_s0 = inlined_call_operand.vmem [shape: bf16[32,256], index: 0, kind: input, shape index: {}]   ;;  %s609_s3 = inlined_call_operand.vmem [shape: bf16[32,128], index: 3, kind: input, shape index: {}]   ;;  %s610_s2 = inlined_call_operand.vmem [shape: f32[1,128], index: 2, kind: input, shape index: {}]   ;;  %s611_s4 = inlined_call_operand.vmem [shape: f32[1,128], index: 4, kind: input, shape index: {}]   ;;  %s612_s5 = inlined_call_operand.vmem [shape: f32[1,128], index: 5, kind: input, shape index: {}]   ;;  %s613_s6 = inlined_call_operand.vmem [shape: bf16[32,128], index: 6, kind: output, shape index: {}]  }
   0x1   :  { %v461_v0 = vld [vmem:[%s607_s1 + $0x40] sm:$0xff]   ;;  %v463_v2 = vld [vmem:[%s607_s1 + $0x48] sm:$0xff]   ;;  %v465_v4 = vld [vmem:[%s607_s1 + $0x50] sm:$0xff]  }
   0x2   :  { %v462_v1 = vld [vmem:[%s607_s1] sm:$0xff]   ;;  %417 = vmatprep.subr.bf16.mxu0 %v461_v0  ;;  %445 = vmatprep.subr.bf16.mxu1 %v461_v0  ;;  %v464_v3 = vld [vmem:[%s607_s1 + $0x8] sm:$0xff]   ;;  %v466_v5 = vld [vmem:[%s607_s1 + $0x10] sm:$0xff]  }
   0x3   :  { %418 = vmatpush3.bf16.msra.mxu0 %v462_v1  ;;  %453 = vmatpush3.bf16.msra.mxu1 %v462_v1  ;;  %v467_v6 = vld [vmem:[%s607_s1 + $0x58] sm:$0xff]   ;;  %v469_v8 = vld [vmem:[%s607_s1 + $0x60] sm:$0xff]   ;;  %v471_v10 = vld [vmem:[%s607_s1 + $0x68] sm:$0xff]  }
   0x4   :  { %419 = vmatprep.subr.bf16.mxu0 %v463_v2  ;;  %446 = vmatprep.subr.bf16.mxu1 %v463_v2  ;;  %v468_v7 = vld [vmem:[%s607_s1 + $0x18] sm:$0xff]   ;;  %v470_v9 = vld [vmem:[%s607_s1 + $0x20] sm:$0xff]   ;;  %v472_v13 = vld [vmem:[%s607_s1 + $0x28] sm:$0xff]  }
   0x5   :  { %v479_v11 = vld [vmem:[%s608_s0 + $0x4] ss:$8 sps:$4 sm:$0xff]   ;;  %v482_v12 = vld [vmem:[%s608_s0 + $0x14] ss:$8 sps:$4 sm:$0xff]   ;;  %v477_v18 = vld [vmem:[%s608_s0] ss:$8 sps:$4 sm:$0xff]  }
   0x6   :  { %v473_v14 = vld [vmem:[%s607_s1 + $0x70] sm:$0xff]   ;;  %220 = vmatprep.mubr.bf16.mxu0 %v479_v11  ;;  %228 = vmatprep.mubr.bf16.mxu1 %v482_v12  ;;  %v475_v16 = vld [vmem:[%s607_s1 + $0x78] sm:$0xff]   ;;  %v415_v20 = vld [vmem:[%s609_s3 + $0x8] sm:$0xff]  }
   0x7   :  { %420 = vmatpush3.bf16.msra.mxu0 %v464_v3  ;;  %454 = vmatpush3.bf16.msra.mxu1 %v464_v3  ;;  %v474_v15 = vld [vmem:[%s607_s1 + $0x30] sm:$0xff]   ;;  %v476_v17 = vld [vmem:[%s607_s1 + $0x38] sm:$0xff]   ;;  %v398_v21 = vld [vmem:[%s609_s3] sm:$0xff]   ;;  %v403_v31 = vunpack.c.l.bf16 %v415_v20  ;;  %v404_v35 = vunpack.c.h.bf16 %v415_v20 }
   0x8   :  { %421 = vmatprep.subr.bf16.mxu0 %v465_v4  ;;  %447 = vmatprep.subr.bf16.mxu1 %v465_v4  ;;  %v480_v19 = vld [vmem:[%s608_s0 + $0x10] ss:$8 sps:$4 sm:$0xff]   ;;  %v386_v25 = vld [vmem:[%s610_s2] ss:$0 sm:$0xff]  ;;  %v399_v32 = vunpack.c.l.bf16 %v398_v21  ;;  %v400_v40 = vunpack.c.h.bf16 %v398_v21 }
   0xb   :  { %422 = vmatpush3.bf16.msra.mxu0 %v466_v5  ;;  %455 = vmatpush3.bf16.msra.mxu1 %v466_v5 }
   0xc   :  { %423 = vmatprep.subr.bf16.mxu0 %v467_v6  ;;  %448 = vmatprep.subr.bf16.mxu1 %v467_v6 }
   0xf   :  { %424 = vmatpush3.bf16.msra.mxu0 %v468_v7  ;;  %456 = vmatpush3.bf16.msra.mxu1 %v468_v7 }
  0x10   :  { %425 = vmatprep.subr.bf16.mxu0 %v469_v8  ;;  %449 = vmatprep.subr.bf16.mxu1 %v469_v8 }
  0x13   :  { %426 = vmatpush3.bf16.msra.mxu0 %v470_v9  ;;  %457 = vmatpush3.bf16.msra.mxu1 %v470_v9 }
  0x14   :  { %427 = vmatprep.subr.bf16.mxu0 %v471_v10  ;;  %450 = vmatprep.subr.bf16.mxu1 %v471_v10 }
  0x17   :  { %428 = vmatpush3.bf16.msra.mxu0 %v472_v13  ;;  %458 = vmatpush3.bf16.msra.mxu1 %v472_v13  ;;  %v387_v13 = vld [vmem:[%s611_s4] ss:$0 sm:$0xff] }
  0x18   :  { %429 = vmatprep.subr.bf16.mxu0 %v473_v14  ;;  %451 = vmatprep.subr.bf16.mxu1 %v473_v14 }
  0x1b   :  { %430 = vmatpush3.bf16.msra.mxu0 %v474_v15  ;;  %459 = vmatpush3.bf16.msra.mxu1 %v474_v15 }
  0x1c   :  { %431 = vmatprep.subr.bf16.mxu0 %v475_v16  ;;  %452 = vmatprep.subr.bf16.mxu1 %v475_v16 }
  0x1f   :  { %432 = vmatpush3.bf16.msra.mxu0 %v476_v17  ;;  %460 = vmatpush3.bf16.msra.mxu1 %v476_v17 }
  0x22   :  { %221 = vmatmul.mubr.bf16.vlgmr.msra.gmra.mrb[0].mxu0 %v477_v18  ;;  %229 = vmatmul.mubr.bf16.vlgmr.msra.gmra.mrb[0].mxu1 %v480_v19  ;;  %v388_v18 = vld [vmem:[%s612_s5] ss:$0 sm:$0xff] }
  0xf5   :  { %v433_v22 = vpop.f32.mrb[0].mxu0  ;;  %v439_v23 = vpop.f32.mrb[0].mxu1 }
  0xf6   :  { %v434_v24 = vpop.f32.mrb[1].mxu0  ;;  %v440_v26 = vpop.f32.mrb[1].mxu1 }
  0xf7   :  { %v435_v27 = vadd.f32 %v434_v24, %v433_v22  ;;  %v441_v28 = vadd.f32 %v440_v26, %v439_v23  ;;  %v436_v29 = vpop.f32.mrb[2].mxu0  ;;  %v442_v30 = vpop.f32.mrb[2].mxu1 }
  0xf8   :  { %v437_v33 = vpop.f32.mrb[3].mxu0  ;;  %v443_v34 = vpop.f32.mrb[3].mxu1 }
  0xf9   :  { %v259_v36 = vadd.f32 %v435_v27, %v386_v25  ;;  %v261_v37 = vadd.f32 %v441_v28, %v386_v25  ;;  %v438_v38 = vadd.f32 %v437_v33, %v436_v29  ;;  %v444_v39 = vadd.f32 %v443_v34, %v442_v30 }
  0xfb   :  { %v260_v41 = vadd.f32 %v438_v38, %v386_v25  ;;  %v262_v42 = vadd.f32 %v444_v39, %v386_v25  ;;  %v273_v43 = vadd.f32 %v403_v31, %v261_v37  ;;  %v271_v44 = vadd.f32 %v399_v32, %v259_v36 }
  0xfd   :  { %279 = vadd.xlane.f32.xlu1 %v273_v43  ;;  %275 = vadd.xlane.f32.xlu0 %v271_v44  ;;  %v274_v45 = vadd.f32 %v404_v35, %v262_v42  ;;  %v272_v46 = vadd.f32 %v400_v40, %v260_v41 }
 0x101   :  { %281 = vadd.xlane.f32.xlu1 %v274_v45  ;;  %277 = vadd.xlane.f32.xlu0 %v272_v46 }
 0x18a   :  { %v280_v47 = vpop.xlane.xlu1 %279  ;;  %v276_v48 = vpop.xlane.xlu0 %275 }
 0x18b   :  { %v286_v49 = vmul.f32 0.0078125, %v280_v47  ;;  %v284_v50 = vmul.f32 0.0078125, %v276_v48 }
 0x18d   :  { %v288_v51 = vsub.f32 %v271_v44, %v284_v50  ;;  %v290_v54 = vsub.f32 %v273_v43, %v286_v49 }
 0x18e   :  { %v282_v52 = vpop.xlane.xlu1 %281  ;;  %v278_v53 = vpop.xlane.xlu0 %277 }
 0x18f   :  { %v287_v55 = vmul.f32 0.0078125, %v282_v52  ;;  %v285_v56 = vmul.f32 0.0078125, %v278_v53  ;;  %v292_v57 = vmul.f32 %v288_v51, %v288_v51  ;;  %v294_v60 = vmul.f32 %v290_v54, %v290_v54 }
 0x191   :  { %v289_v58 = vsub.f32 %v272_v46, %v285_v56  ;;  %296 = vadd.xlane.f32.xlu0 %v292_v57  ;;  %v291_v59 = vsub.f32 %v274_v45, %v287_v55 }
 0x193   :  { %v293_v61 = vmul.f32 %v289_v58, %v289_v58  ;;  %v295_v62 = vmul.f32 %v291_v59, %v291_v59 }
 0x195   :  { %300 = vadd.xlane.f32.xlu0 %v294_v60  ;;  %298 = vadd.xlane.f32.xlu1 %v293_v61 }
 0x199   :  { %302 = vadd.xlane.f32.xlu1 %v295_v62 }
 0x21e   :  { %v297_v63 = vpop.xlane.xlu0 %296 }
 0x21f   :  { %v304_v0 = vmul.f32 0.0078125, %v297_v63 }
 0x221   :  { %v308_v1 = vadd.f32 1e-12, %v304_v0 }
 0x222   :  { %v299_v2 = vpop.xlane.xlu1 %298  ;;  %v301_v3 = vpop.xlane.xlu0 %300 }
 0x223   :  { %483 = vrsqrt.f32 %v308_v1  ;;  %v305_v4 = vmul.f32 0.0078125, %v299_v2  ;;  %v306_v5 = vmul.f32 0.0078125, %v301_v3 }
 0x225   :  { %v309_v6 = vadd.f32 1e-12, %v305_v4  ;;  %v310_v7 = vadd.f32 1e-12, %v306_v5 }
 0x226   :  { %v303_v8 = vpop.xlane.xlu1 %302 }
 0x227   :  { %485 = vrsqrt.f32 %v309_v6  ;;  %v307_v9 = vmul.f32 0.0078125, %v303_v8 }
 0x228   :  { %487 = vrsqrt.f32 %v310_v7 }
 0x229   :  { %v311_v10 = vadd.f32 1e-12, %v307_v9 }
 0x22b   :  { %489 = vrsqrt.f32 %v311_v10 }
 0x22d   :  { %v484_v11 = vpop.eup %483 }
 0x22e   :  { %v316_v12 = vmul.f32 %v484_v11, %v288_v51 }
 0x230   :  { %v327_v16 = vmul.f32 %v387_v13, %v316_v12 }
 0x231   :  { %v486_v14 = vpop.eup %485 }
 0x232   :  { %v488_v15 = vpop.eup %487  ;;  %v317_v17 = vmul.f32 %v486_v14, %v289_v58  ;;  %v338_v22 = vadd.f32 %v388_v18, %v327_v16 }
 0x233   :  { %v318_v19 = vmul.f32 %v488_v15, %v290_v54 }
 0x234   :  { %v328_v20 = vmul.f32 %v387_v13, %v317_v17 }
 0x235   :  { %v490_v21 = vpop.eup %489  ;;  %v329_v24 = vmul.f32 %v387_v13, %v318_v19 }
 0x236   :  { %v339_v23 = vadd.f32 %v388_v18, %v328_v20  ;;  %v319_v25 = vmul.f32 %v490_v21, %v291_v59 }
 0x237   :  { %v340_v28 = vadd.f32 %v388_v18, %v329_v24 }
 0x238   :  { %v408_v26 = vpack.c.bf16 %v339_v23, %v338_v22  ;;  %v330_v27 = vmul.f32 %v387_v13, %v319_v25 }
 0x23a   :  { %409 = vst [vmem:[%s613_s6] sm:$0xff] %v408_v26   ;;  %v341_v29 = vadd.f32 %v388_v18, %v330_v27 }
 0x23c   :  { %v413_v30 = vpack.c.bf16 %v341_v29, %v340_v28 }
 0x23e   :  { %416 = vst [vmem:[%s613_s6 + $0x8] sm:$0xff] %v413_v30  }

</bundles_post_ra>
